<compile_context>
chip_gen: v5e
topology: v5e:2x2
jax: 0.10.0
libtpu: 0.0.40
codegen_flags: <defaults>
</compile_context>

<pallas_src>
import jax
import jax.numpy as jnp
from jax.experimental import pallas as pl
from jax.experimental.pallas import tpu as pltpu

LN_EPS = 1e-5  # PyTorch nn.LayerNorm default eps


def _round_up(x, m):
    return ((x + m - 1) // m) * m


def _alignment_kernel(x_ref, w1_ref, b1_ref, red_ref, bc_ref, gam_ref, bet_ref,
                      out_ref):
    """One batch tile: fused linear -> ReLU -> chunked LayerNorm -> affine."""
    # Fused branch linears: one dense matmul, batch rides the MXU M axis.
    y = jnp.dot(x_ref[...], w1_ref[...], preferred_element_type=jnp.float32)
    y = jnp.maximum(y + b1_ref[...], 0.0)                        # bias + ReLU
    # TODO(synk): DeterministicDropout is identity in eval mode (training=False).

    # Chunked LayerNorm over every H-wide lane group, factored:
    #   reduce (MXU) -> per-chunk stats (VPU/EUP on 128 lanes) -> broadcast (MXU).
    mu_c = jnp.dot(y, red_ref[...], preferred_element_type=jnp.float32)
    ms_c = jnp.dot(y * y, red_ref[...], preferred_element_type=jnp.float32)
    var_c = jnp.maximum(ms_c - mu_c * mu_c, 0.0)                 # E[y^2]-mu^2
    inv_c = jax.lax.rsqrt(var_c + LN_EPS)
    scale = jnp.dot(inv_c, bc_ref[...], preferred_element_type=jnp.float32)
    shift = jnp.dot(mu_c * inv_c, bc_ref[...], preferred_element_type=jnp.float32)

    # gamma/beta elementwise; single fully lane-dense [BB, T*3H] store.
    out_ref[...] = (y * scale - shift) * gam_ref[...] + bet_ref[...]


def _pack_operands(p, L, T, Fh, Ff, S, H, mxu_dtype):
    """Fold the 16 per-layer parameters into 6 kernel operands."""
    Dh, Df = L * Fh, T * Ff
    D_in = Dh + Df + S
    K_pad = _round_up(D_in, 128)
    N_out = T * 3 * H
    n_chunks = N_out // H
    C_pad = _round_up(n_chunks, 128)

    w_th, b_th = p["w_th"], p["b_th"]          # [T, L], [T]
    w_mh, b_mh = p["w_mh"], p["b_mh"]          # [Fh, H], [H]   ([in, out])
    w_tf, b_tf = p["w_tf"], p["b_tf"]          # [T, T], [T]
    w_mf, b_mf = p["w_mf"], p["b_mf"]          # [Ff, H], [H]
    w_ms, b_ms = p["w_ms"], p["b_ms"]          # [S, H], [H]

    # Fused (temporal o feature-mix) weights, columns laid out in the final
    # interleaved [t, (hist|fut|static), h] order.
    wh = jnp.einsum("tl,fh->lfth", w_th, w_mh).reshape(Dh, T, H)
    wf = jnp.einsum("ts,fh->sfth", w_tf, w_mf).reshape(Df, T, H)
    ws = jnp.broadcast_to(w_ms[:, None, :], (S, T, H))
    w1 = jnp.zeros((K_pad, T, 3 * H), jnp.float32)
    w1 = w1.at[:Dh, :, 0:H].set(wh)
    w1 = w1.at[Dh:Dh + Df, :, H:2 * H].set(wf)
    w1 = w1.at[Dh + Df:D_in, :, 2 * H:3 * H].set(ws)
    w1 = w1.reshape(K_pad, N_out).astype(mxu_dtype)

    # Effective bias: temporal bias folded through the feature-mix weight.
    bh = b_th[:, None] * jnp.sum(w_mh, axis=0)[None, :] + b_mh[None, :]   # [T,H]
    bf = b_tf[:, None] * jnp.sum(w_mf, axis=0)[None, :] + b_mf[None, :]   # [T,H]
    bs = jnp.broadcast_to(b_ms[None, :], (T, H))
    b1 = jnp.concatenate([bh, bf, bs], axis=-1).reshape(1, N_out)
    b1 = b1.astype(jnp.float32)

    # Factored chunked-LayerNorm matrices: reduce to per-chunk stats, then
    # broadcast back (padded chunk columns/rows are all-zero -> no effect).
    chunk_of_lane = jnp.arange(N_out) // H
    red = (chunk_of_lane[:, None] == jnp.arange(C_pad)[None, :]
           ).astype(jnp.float32) / H                              # [N_out, C_pad]
    bc = (jnp.arange(C_pad)[:, None] == chunk_of_lane[None, :]
          ).astype(jnp.float32)                                   # [C_pad, N_out]

    gamma = jnp.tile(jnp.concatenate([p["g_h"], p["g_f"], p["g_s"]]), T)
    beta = jnp.tile(jnp.concatenate([p["be_h"], p["be_f"], p["be_s"]]), T)
    gamma = gamma.reshape(1, N_out).astype(jnp.float32)
    beta = beta.reshape(1, N_out).astype(jnp.float32)
    return w1, b1, red, bc, gamma, beta


def alignment_stage(historical, future, static, params, *, block_b=512,
                    mxu_dtype=jnp.bfloat16):
    """Pallas forward of AlignmentStage (eval mode). Output: [B, T, 3H] f32."""
    B, L, Fh = historical.shape
    _, T, Ff = future.shape
    S = static.shape[1]
    H = params["g_h"].shape[0]

    Dh, Df = L * Fh, T * Ff
    D_in = Dh + Df + S
    K_pad = _round_up(D_in, 128)
    N_out = T * 3 * H

    w1, b1, red, bc, gamma, beta = _pack_operands(
        params, L, T, Fh, Ff, S, H, mxu_dtype)

    # One lane-dense input slab: [hist | future | static | zero-pad] -> [B, K_pad].
    x = jnp.concatenate(
        [historical.reshape(B, Dh).astype(jnp.float32),
         future.reshape(B, Df).astype(jnp.float32),
         static.astype(jnp.float32),
         jnp.zeros((B, K_pad - D_in), jnp.float32)],
        axis=-1).astype(mxu_dtype)

    # Batch tile: multiple of 16 (bf16 sublane packing); keep >= ~4 grid steps
    # so both v7x TensorCores and the pipeline stay busy for small batches.
    cap = _round_up(max(B // 4, 16), 16)
    block_b = max(16, min(_round_up(int(block_b), 16), cap))
    grid = (pl.cdiv(B, block_b),)        # ragged last block handled by Pallas

    def const_spec(arr):
        return pl.BlockSpec(arr.shape, lambda b: (0, 0))

    out = pl.pallas_call(
        _alignment_kernel,
        out_shape=jax.ShapeDtypeStruct((B, N_out), jnp.float32),
        grid_spec=pltpu.PrefetchScalarGridSpec(
            num_scalar_prefetch=0,
            grid=grid,
            in_specs=[
                pl.BlockSpec((block_b, K_pad), lambda b: (b, 0)),
                const_spec(w1), const_spec(b1), const_spec(red),
                const_spec(bc), const_spec(gamma), const_spec(beta),
            ],
            out_specs=pl.BlockSpec((block_b, N_out), lambda b: (b, 0)),
        ),
        compiler_params=pltpu.CompilerParams(
            # Batch-tile grid shards across TensorCores (v7x megacore).
            dimension_semantics=("parallel",),
            vmem_limit_bytes=32 * 1024 * 1024,
        ),
    )(x, w1, b1, red, bc, gamma, beta)

    # Columns already sit in the interleaved [t, 3H] order: free reshape.
    return out.reshape(B, T, 3 * H)


def ref_forward(historical, future, static, p):
    """Plain-JAX reference mirroring the PyTorch forward (eval mode)."""
    def ln(x, g, b):
        mu = x.mean(-1, keepdims=True)
        var = ((x - mu) ** 2).mean(-1, keepdims=True)
        return (x - mu) / jnp.sqrt(var + LN_EPS) * g + b

    hp = jnp.einsum("tl,blf->btf", p["w_th"], historical) + p["b_th"][None, :, None]
    hm = ln(jax.nn.relu(jnp.einsum("btf,fh->bth", hp, p["w_mh"]) + p["b_mh"]),
            p["g_h"], p["be_h"])
    fp = jnp.einsum("ts,bsf->btf", p["w_tf"], future) + p["b_tf"][None, :, None]
    fm = ln(jax.nn.relu(jnp.einsum("btf,fh->bth", fp, p["w_mf"]) + p["b_mf"]),
            p["g_f"], p["be_f"])
    sm = ln(jax.nn.relu(static @ p["w_ms"] + p["b_ms"]), p["g_s"], p["be_s"])
    sm = jnp.broadcast_to(sm[:, None, :], fm.shape)
    return jnp.concatenate([hm, fm, sm], axis=-1)


if __name__ == "__main__":
    # Small shapes consistent with the module's forward semantics.
    B, L, T = 64, 16, 8            # batch, input_len, output_len
    Fh, Ff, S, H = 4, 3, 5, 32     # input_size, future_input_size, static_size, hidden

    key = jax.random.PRNGKey(0)
    ks = jax.random.split(key, 20)

    params = {
        # TemporalProjection(historical): Linear(L, T) applied along time
        "w_th": jax.random.normal(ks[0], (T, L), jnp.float32) * 0.1,
        "b_th": jax.random.normal(ks[1], (T,), jnp.float32) * 0.1,
        # historical feature mixing: Linear(Fh, H) (weight stored [in, out])
        "w_mh": jax.random.normal(ks[2], (Fh, H), jnp.float32) * 0.1,
        "b_mh": jax.random.normal(ks[3], (H,), jnp.float32) * 0.1,
        "g_h": 1.0 + 0.1 * jax.random.normal(ks[4], (H,), jnp.float32),
        "be_h": 0.1 * jax.random.normal(ks[5], (H,), jnp.float32),
        # TemporalProjection(future): Linear(T, T)
        "w_tf": jax.random.normal(ks[6], (T, T), jnp.float32) * 0.1,
        "b_tf": jax.random.normal(ks[7], (T,), jnp.float32) * 0.1,
        # future feature mixing: Linear(Ff, H)
        "w_mf": jax.random.normal(ks[8], (Ff, H), jnp.float32) * 0.1,
        "b_mf": jax.random.normal(ks[9], (H,), jnp.float32) * 0.1,
        "g_f": 1.0 + 0.1 * jax.random.normal(ks[10], (H,), jnp.float32),
        "be_f": 0.1 * jax.random.normal(ks[11], (H,), jnp.float32),
        # static feature mixing: Linear(S, H)
        "w_ms": jax.random.normal(ks[12], (S, H), jnp.float32) * 0.1,
        "b_ms": jax.random.normal(ks[13], (H,), jnp.float32) * 0.1,
        "g_s": 1.0 + 0.1 * jax.random.normal(ks[14], (H,), jnp.float32),
        "be_s": 0.1 * jax.random.normal(ks[15], (H,), jnp.float32),
    }

    historical = jax.random.normal(ks[16], (B, L, Fh), jnp.float32)
    future = jax.random.normal(ks[17], (B, T, Ff), jnp.float32)
    static = jax.random.normal(ks[18], (B, S), jnp.float32)

    # f32 MXU path: tight numerical check against the plain-JAX reference.
    out_f32 = alignment_stage(historical, future, static, params,
                              block_b=32, mxu_dtype=jnp.float32)
    out_f32 = jax.block_until_ready(out_f32)

    # bf16 MXU path (the performance default on v5e/v6e/v7x): looser tolerance.
    out_bf16 = alignment_stage(historical, future, static, params, block_b=32)
    out_bf16 = jax.block_until_ready(out_bf16)

    with jax.default_matmul_precision("highest"):
        ref = ref_forward(historical, future, static, params)
    ref = jax.block_until_ready(ref)

    assert out_f32.shape == (B, T, 3 * H)
    assert out_bf16.shape == (B, T, 3 * H)
    assert jnp.allclose(out_f32, ref, atol=1e-3, rtol=1e-3), (
        float(jnp.max(jnp.abs(out_f32 - ref))))
    assert jnp.allclose(out_bf16, ref, atol=2e-2, rtol=2e-2), (
        float(jnp.max(jnp.abs(out_bf16 - ref))))

    print("KERNEL_OK")
</pallas_src>

<mosaic_0001>
module attributes {stable_mosaic.version = 11 : i64} {
  func.func @_alignment_kernel(%arg0: i32, %arg1: memref<16x128xf32, #tpu.memory_space<vmem>>, %arg2: memref<128x768xf32, #tpu.memory_space<vmem>>, %arg3: memref<1x768xf32, #tpu.memory_space<vmem>>, %arg4: memref<768x128xf32, #tpu.memory_space<vmem>>, %arg5: memref<128x768xf32, #tpu.memory_space<vmem>>, %arg6: memref<1x768xf32, #tpu.memory_space<vmem>>, %arg7: memref<1x768xf32, #tpu.memory_space<vmem>>, %arg8: memref<16x768xf32, #tpu.memory_space<vmem>>) attributes {dimension_semantics = [#tpu.dimension_semantics<parallel>], iteration_bounds = array<i64: 4>, scalar_prefetch = 0 : i64, scratch_operands = 0 : i64, tpu.core_type = #tpu.core_type<tc>, window_params = [{transform_indices = @transform_0, window_bounds = array<i64: 16, 128>}, {pipeline_mode = #tpu.pipeline_mode<synchronous>, transform_indices = @transform_1, window_bounds = array<i64: 128, 768>}, {pipeline_mode = #tpu.pipeline_mode<synchronous>, transform_indices = @transform_2, window_bounds = array<i64: 1, 768>}, {pipeline_mode = #tpu.pipeline_mode<synchronous>, transform_indices = @transform_3, window_bounds = array<i64: 768, 128>}, {pipeline_mode = #tpu.pipeline_mode<synchronous>, transform_indices = @transform_4, window_bounds = array<i64: 128, 768>}, {pipeline_mode = #tpu.pipeline_mode<synchronous>, transform_indices = @transform_5, window_bounds = array<i64: 1, 768>}, {pipeline_mode = #tpu.pipeline_mode<synchronous>, transform_indices = @transform_6, window_bounds = array<i64: 1, 768>}, {transform_indices = @transform_7, window_bounds = array<i64: 16, 768>}]} {
    %c0 = arith.constant 0 : index
    %c0_0 = arith.constant 0 : index
    %0 = vector.load %arg1[%c0, %c0_0] : memref<16x128xf32, #tpu.memory_space<vmem>>, vector<16x128xf32>
    %c0_1 = arith.constant 0 : index
    %c0_2 = arith.constant 0 : index
    %1 = vector.load %arg2[%c0_1, %c0_2] : memref<128x768xf32, #tpu.memory_space<vmem>>, vector<128x768xf32>
    %cst = arith.constant dense<0.000000e+00> : vector<16x768xf32>
    %2 = tpu.matmul %0, %1, %cst {dimension_numbers = #tpu.dot_dimension_numbers<[1], [0], [0], [1], [0, 0, 1, 1], [], []>} : vector<16x128xf32>, vector<128x768xf32>, vector<16x768xf32> -> vector<16x768xf32>
    %c0_3 = arith.constant 0 : index
    %c0_4 = arith.constant 0 : index
    %3 = vector.load %arg3[%c0_3, %c0_4] : memref<1x768xf32, #tpu.memory_space<vmem>>, vector<1x768xf32>
    %4 = vector.broadcast %3 : vector<1x768xf32> to vector<16x768xf32>
    %5 = arith.addf %2, %4 : vector<16x768xf32>
    %cst_5 = arith.constant 0.000000e+00 : f32
    %6 = vector.broadcast %cst_5 : f32 to vector<16x768xf32>
    %7 = arith.maximumf %5, %6 : vector<16x768xf32>
    %c0_6 = arith.constant 0 : index
    %c0_7 = arith.constant 0 : index
    %8 = vector.load %arg4[%c0_6, %c0_7] : memref<768x128xf32, #tpu.memory_space<vmem>>, vector<768x128xf32>
    %cst_8 = arith.constant dense<0.000000e+00> : vector<16x128xf32>
    %9 = tpu.matmul %7, %8, %cst_8 {dimension_numbers = #tpu.dot_dimension_numbers<[1], [0], [0], [1], [0, 0, 1, 1], [], []>} : vector<16x768xf32>, vector<768x128xf32>, vector<16x128xf32> -> vector<16x128xf32>
    %10 = arith.mulf %7, %7 : vector<16x768xf32>
    %c0_9 = arith.constant 0 : index
    %c0_10 = arith.constant 0 : index
    %11 = vector.load %arg4[%c0_9, %c0_10] : memref<768x128xf32, #tpu.memory_space<vmem>>, vector<768x128xf32>
    %cst_11 = arith.constant dense<0.000000e+00> : vector<16x128xf32>
    %12 = tpu.matmul %10, %11, %cst_11 {dimension_numbers = #tpu.dot_dimension_numbers<[1], [0], [0], [1], [0, 0, 1, 1], [], []>} : vector<16x768xf32>, vector<768x128xf32>, vector<16x128xf32> -> vector<16x128xf32>
    %13 = arith.mulf %9, %9 : vector<16x128xf32>
    %14 = arith.subf %12, %13 : vector<16x128xf32>
    %cst_12 = arith.constant 0.000000e+00 : f32
    %15 = vector.broadcast %cst_12 : f32 to vector<16x128xf32>
    %16 = arith.maximumf %14, %15 : vector<16x128xf32>
    %cst_13 = arith.constant 9.99999974E-6 : f32
    %17 = vector.broadcast %cst_13 : f32 to vector<16x128xf32>
    %18 = arith.addf %16, %17 : vector<16x128xf32>
    %19 = math.rsqrt %18 : vector<16x128xf32>
    %c0_14 = arith.constant 0 : index
    %c0_15 = arith.constant 0 : index
    %20 = vector.load %arg5[%c0_14, %c0_15] : memref<128x768xf32, #tpu.memory_space<vmem>>, vector<128x768xf32>
    %cst_16 = arith.constant dense<0.000000e+00> : vector<16x768xf32>
    %21 = tpu.matmul %19, %20, %cst_16 {dimension_numbers = #tpu.dot_dimension_numbers<[1], [0], [0], [1], [0, 0, 1, 1], [], []>} : vector<16x128xf32>, vector<128x768xf32>, vector<16x768xf32> -> vector<16x768xf32>
    %22 = arith.mulf %9, %19 : vector<16x128xf32>
    %c0_17 = arith.constant 0 : index
    %c0_18 = arith.constant 0 : index
    %23 = vector.load %arg5[%c0_17, %c0_18] : memref<128x768xf32, #tpu.memory_space<vmem>>, vector<128x768xf32>
    %cst_19 = arith.constant dense<0.000000e+00> : vector<16x768xf32>
    %24 = tpu.matmul %22, %23, %cst_19 {dimension_numbers = #tpu.dot_dimension_numbers<[1], [0], [0], [1], [0, 0, 1, 1], [], []>} : vector<16x128xf32>, vector<128x768xf32>, vector<16x768xf32> -> vector<16x768xf32>
    %25 = arith.mulf %7, %21 : vector<16x768xf32>
    %26 = arith.subf %25, %24 : vector<16x768xf32>
    %c0_20 = arith.constant 0 : index
    %c0_21 = arith.constant 0 : index
    %27 = vector.load %arg6[%c0_20, %c0_21] : memref<1x768xf32, #tpu.memory_space<vmem>>, vector<1x768xf32>
    %28 = vector.broadcast %27 : vector<1x768xf32> to vector<16x768xf32>
    %29 = arith.mulf %26, %28 : vector<16x768xf32>
    %c0_22 = arith.constant 0 : index
    %c0_23 = arith.constant 0 : index
    %30 = vector.load %arg7[%c0_22, %c0_23] : memref<1x768xf32, #tpu.memory_space<vmem>>, vector<1x768xf32>
    %31 = vector.broadcast %30 : vector<1x768xf32> to vector<16x768xf32>
    %32 = arith.addf %29, %31 : vector<16x768xf32>
    %c0_24 = arith.constant 0 : index
    %c0_25 = arith.constant 0 : index
    %33 = vector.load %arg8[%c0_24, %c0_25] : memref<16x768xf32, #tpu.memory_space<vmem>>, vector<16x768xf32>
    tpu.vector_store %arg8[%c0_24, %c0_25], %32 {strides = array<i32>} : memref<16x768xf32, #tpu.memory_space<vmem>>, vector<16x768xf32>,
    return
  }
  func.func @transform_0(%arg0: i32) -> (i32, i32) {
    %c0_i32 = arith.constant 0 : i32
    %c0_i32_0 = arith.constant 0 : i32
    return %arg0, %c0_i32 : i32, i32
  }
  func.func @transform_1(%arg0: i32) -> (i32, i32) {
    %c0_i32 = arith.constant 0 : i32
    %c0_i32_0 = arith.constant 0 : i32
    %c0_i32_1 = arith.constant 0 : i32
    return %c0_i32, %c0_i32_0 : i32, i32
  }
  func.func @transform_2(%arg0: i32) -> (i32, i32) {
    %c0_i32 = arith.constant 0 : i32
    %c0_i32_0 = arith.constant 0 : i32
    %c0_i32_1 = arith.constant 0 : i32
    return %c0_i32, %c0_i32_0 : i32, i32
  }
  func.func @transform_3(%arg0: i32) -> (i32, i32) {
    %c0_i32 = arith.constant 0 : i32
    %c0_i32_0 = arith.constant 0 : i32
    %c0_i32_1 = arith.constant 0 : i32
    return %c0_i32, %c0_i32_0 : i32, i32
  }
  func.func @transform_4(%arg0: i32) -> (i32, i32) {
    %c0_i32 = arith.constant 0 : i32
    %c0_i32_0 = arith.constant 0 : i32
    %c0_i32_1 = arith.constant 0 : i32
    return %c0_i32, %c0_i32_0 : i32, i32
  }
  func.func @transform_5(%arg0: i32) -> (i32, i32) {
    %c0_i32 = arith.constant 0 : i32
    %c0_i32_0 = arith.constant 0 : i32
    %c0_i32_1 = arith.constant 0 : i32
    return %c0_i32, %c0_i32_0 : i32, i32
  }
  func.func @transform_6(%arg0: i32) -> (i32, i32) {
    %c0_i32 = arith.constant 0 : i32
    %c0_i32_0 = arith.constant 0 : i32
    %c0_i32_1 = arith.constant 0 : i32
    return %c0_i32, %c0_i32_0 : i32, i32
  }
  func.func @transform_7(%arg0: i32) -> (i32, i32) {
    %c0_i32 = arith.constant 0 : i32
    %c0_i32_0 = arith.constant 0 : i32
    return %arg0, %c0_i32 : i32, i32
  }
}

</mosaic_0001>

<bundles_post_ra>
// kernel: tpu_custom_call.1
= control target key start
LH: loop header
LB: loop body
LE: loop exit
PB: predicated region body
PF: predicated region fallthrough
CT: control target
= control target key end

     0   :  { %s3359_s0 = inlined_call_operand.hbm [shape: f32[64,128], index: 0, kind: input, shape index: {}]   ;;  %s3360_s1 = inlined_call_operand.hbm [shape: f32[128,768], index: 1, kind: input, shape index: {}]   ;;  %s3361_s2 = inlined_call_operand.hbm [shape: f32[1,768], index: 2, kind: input, shape index: {}]   ;;  %s3362_s3 = inlined_call_operand.hbm [shape: f32[768,128], index: 3, kind: input, shape index: {}]   ;;  %s3363_s4 = inlined_call_operand.hbm [shape: f32[128,768], index: 4, kind: input, shape index: {}]   ;;  %s3364_s5 = inlined_call_operand.hbm [shape: f32[1,768], index: 5, kind: input, shape index: {}]   ;;  %s3365_s6 = inlined_call_operand.hbm [shape: f32[1,768], index: 6, kind: input, shape index: {}]   ;;  %s3366_s7 = inlined_call_operand.hbm [shape: f32[64,768], index: 7, kind: output, shape index: {}]  }
   0x1   :  { %3434 = sst [smem:[#allocation59_spill]] %s3360_s1 }
   0x2   :  { %3435 = sst [smem:[#allocation60_spill]] %s3361_s2 }
   0x3   :  { %12 = vsyncpa [#allocation3], 0 }
   0x4   :  { %14 = vsyncpa [#allocation3 + $0x1], 0 }
   0x5   :  { %15 = vsyncpa [#allocation6], 0 }
   0x6   :  { %16 = vsyncpa [#allocation9], 0 }
   0x7   :  { %17 = vsyncpa [#allocation12], 0 }
   0x8   :  { %18 = vsyncpa [#allocation4], 0 }
   0x9   :  { %20 = vsyncpa [#allocation4 + $0x1], 0  ;;  %s2196_s24 = smov 0   ;;  %s2198_s25 = smov 0  }
   0xa   :  { %s2200_s26 = smov 0   ;;  %s2202_s27 = smov 0  }
   0xb LB: > { %s3436_s1 = sld [smem:[#allocation59_spill]]  ;;  %s2220_s8 = sadd.s32 4294967295, %s2142_s27   ;;  %s2142_s27 = sphi %s2202_s27, %s3562_s27   ;;  %s2138_s26 = sphi %s2200_s26, %s3561_s26   ;;  %s2134_s25 = sphi %s2198_s25, %s3560_s25   ;;  %s2130_s24 = sphi %s2196_s24, %s3559_s24  }
   0xc   : > { %p1678_p0 = scmp.ge.s32.totalorder %s2142_s27, 1  ;;  %p47_p1 = scmp.eq.s32.totalorder %s2220_s8, 0 }
   0xd   : > { %p209_p2 = scmp.lt.s32.totalorder %s2142_s27, 5  ;;  %s2144_s10 = smov [#allocation5]  }
   0xe   : > { %s222_s11 = sshll.u32 %s2144_s10, 4  ;;  %s246_s14 = sshll.u32 %s3362_s3, 4  ;;  %s223_s11 = int_to_ptr.vmem [resolvable:$true] %s222_s11  ;;  %s247_s14 = int_to_ptr.hbm [resolvable:$true] %s246_s14 }
   0xf   : > { %p2225_p3 = pnand %p1678_p0, %p209_p2  ;;  %s2145_s16 = smov [#allocation8]  }
  0x10   : > { %s248_s17 = sshll.u32 %s2145_s16, 4  ;;  %s2146_s18 = smov 768   ;;  %s249_s17 = int_to_ptr.vmem [resolvable:$true] %s248_s17 }
  0x11   : > { %s220_s30 = sshll.u32 %s3436_s1, 4  ;;  %p1765_p4 = pneg %p2225_p3  ;;  %s221_s30 = int_to_ptr.hbm [resolvable:$true] %s220_s30 }
  0x12   : > { %s2147_s19 = smov 48   ;;  %s3367_s20 = smov 128  }
  0x13   : > { %p2236_p5 = pnand %p1765_p4, %p47_p1  ;;  %s3368_s21 = smov 8  }
  0x14   : > { %s275_s28 = sshll.u32 %s3364_s5, 4  ;;  %s2150_s29 = smov [#allocation11]   ;;  %s276_s28 = int_to_ptr.hbm [resolvable:$true] %s275_s28 }
  0x15   : > { %1768 = dma.hbm_to_vmem [thread:$0]  (!%p2236_p5), %s221_s30, 12288, %s223_s11, [#allocation6], %s2146_s18, %s2146_s18, %s2147_s19  }
  0x16   : > { %1774 = dma.hbm_to_vmem [thread:$0]  (!%p2236_p5), %s247_s14, 12288, %s249_s17, [#allocation9], %s3367_s20, %s3367_s20, %s3368_s21  }
  0x17   : > { %s277_s10 = sshll.u32 %s2150_s29, 4  ;;  %s3439_s2 = sld [smem:[#allocation60_spill]]  ;;  %s278_s10 = int_to_ptr.vmem [resolvable:$true] %s277_s10 }
  0x18   : > { %1780 = dma.hbm_to_vmem [thread:$0]  (!%p2236_p5), %s276_s28, 96, %s278_s10, [#allocation12]  }
  0x19   : > { %s2151_s13 = smov [#allocation7]   ;;  %s260_s22 = sshll.u32 %s3363_s4, 4  ;;  %s261_s22 = int_to_ptr.hbm [resolvable:$true] %s260_s22 }
  0x1a   : > { %s237_s14 = sshll.u32 %s2151_s13, 4  ;;  %s287_s28 = sshll.u32 %s3365_s6, 4  ;;  %s238_s14 = int_to_ptr.vmem [resolvable:$true] %s237_s14  ;;  %s288_s28 = int_to_ptr.hbm [resolvable:$true] %s287_s28 }
  0x1b   : > { %s2152_s10 = smov [#allocation10]   ;;  %s2153_s30 = smov [#allocation13]  }
  0x1c   : > { %s262_s12 = sshll.u32 %s2152_s10, 4  ;;  %s1677_s13 = sadd.s32 4294967294, %s2142_s27   ;;  %s263_s12 = int_to_ptr.vmem [resolvable:$true] %s262_s12 }
  0x1d   : > { %s235_s11 = sshll.u32 %s3439_s2, 4  ;;  %s33_s17 = sadd.s32 1, %s2138_s26  ;;  %s236_s11 = int_to_ptr.hbm [resolvable:$true] %s235_s11 }
  0x1e   : > { %1771 = dma.hbm_to_vmem [thread:$0]  (!%p2236_p5), %s236_s11, 96, %s238_s14, [#allocation6]  }
  0x1f   : > { %1777 = dma.hbm_to_vmem [thread:$0]  (!%p2236_p5), %s261_s22, 12288, %s263_s12, [#allocation9], %s2146_s18, %s2146_s18, %s2147_s19  }
  0x20   : > { %s289_s11 = sshll.u32 %s2153_s30, 4  ;;  %s2269_s14 = sadd.s32 1, %s2142_s27   ;;  %s290_s11 = int_to_ptr.vmem [resolvable:$true] %s289_s11 }
  0x21   : > { %1783 = dma.hbm_to_vmem [thread:$0]  (!%p2236_p5), %s288_s28, 96, %s290_s11, [#allocation12]  }
  0x22   : > { %s30_s16 = ssub.s32 %s2142_s27, %s2269_s14  ;;  %p40_p7 = scmp.ne.s32.totalorder %s2138_s26, %s2134_s25 }
  0x23   : > { %p31_p6 = scmp.eq.s32.totalorder %s30_s16, 0  ;;  %p41_p8 = scmp.eq.s32.totalorder %s2142_s27, 0 }
  0x24   : > { %p46_p9 = scmp.ne.s32.totalorder %s2134_s25, %s2130_s24  ;;  %p196_p12 = scmp.eq.s32.totalorder %s2220_s8, 3 }
  0x25   : > { %s2280_s18 = scalar_select %p31_p6, %s2138_s26, %s33_s17  }
  0x26   : > { %p2282_p10 = por %p41_p8, %p40_p7  ;;  %p2288_p11 = por %p47_p1, %p46_p9 }
  0x27   : > { %p202_p13 = scmp.eq.s32.totalorder %s1677_s13, 3  ;;  %p1798_p0 = scmp.lt.s32.totalorder %s2142_s27, 4 }
  0x28   : > { %s300_s22 = sand.u32 1, %s2138_s26   ;;  %p2295_p2 = por %p196_p12, %p40_p7 }
  0x29   : > { %p2299_p4 = por %p202_p13, %p46_p9  ;;  %s1686_s28 = sshll.u32 %s300_s22, 4 }
  0x2a   : > { %s1702_s10 = sshll.u32 %s2142_s27, 4  ;;  %s304_s16 = scalar_lea.vmem [#allocation2], %s1686_s28 }
  0x2b   : > { %s309_s11 = scalar_lea.hbm %s3359_s0, %s1702_s10  ;;  %s312_s17 = sshll.u32 %s304_s16, 4  ;;  %s313_s17 = int_to_ptr.vmem [resolvable:$true] %s312_s17 }
  0x2c   : > { %s310_s20 = sshll.u32 %s309_s11, 4  ;;  %p2309_p5 = pnand %p1798_p0, %p2282_p10  ;;  %s311_s20 = int_to_ptr.hbm [resolvable:$true] %s310_s20 }
  0x2d   : > { %s301_s21 = scalar_lea.sflag [#allocation3], %s300_s22  ;;  %s2034_s1 = sshra.s32 %s311_s20, 4  ;;  %s2035_s1 = int_to_ptr.hbm [resolvable:$true] %s2034_s1 }
  0x2e   : > { %s2036_s2 = scalar_lea.hbm %s2035_s1, 16  ;;  %p2038_p7 = pneg %p2309_p5 }
  0x2f   : > { %p2037_p6 = scmp.ne.s32.totalorder %s2035_s1, %s2036_s2  ;;  %s2041_s12 = scalar_lea.hbm %s3359_s0, 64 }
  0x30   : > { %p2042_p10 = scmp.lt.s32.totalorder %s2035_s1, %s3359_s0  ;;  %p2043_p12 = scmp.lt.s32.totalorder %s2041_s12, %s2036_s2 }
  0x31   : > { %p2039_p8 = pnand %p2038_p7, %p2037_p6 }
  0x32   : > { %p2044_p13 = por %p2043_p12, %p2042_p10 }
  0x33   : > { %p2040_p9 = pneg %p2039_p8 }
  0x35   : > { %p2045_p0 = pnand %p2044_p13, %p2040_p9 }
  0x37   : > { %2048 = shalt.err (!%p2045_p0)
}
  0x38   : > { %s3445_s22 = smov 8   ;;  %s3446_s11 = smov 128  }
  0x39   : > { %1787 = dma.hbm_to_vmem [thread:$0]  (!%p2309_p5), %s311_s20, 256, %s313_s17, %s301_s21, %s3446_s11, %s3446_s11, %s3445_s22  }
  0x3a   : > { %324 = sbr.rel (%p2225_p3) target bundleno = 663 (0x297), region = 48 }
  0x3f   : > { %s2329_s16 = sand.u32 1, %s2134_s25  }
  0x40   : > { %s1690_s1 = sshll.u32 %s2329_s16, 4  ;;  %s327_s2 = scalar_lea.sflag [#allocation3], %s2329_s16 }
  0x41   : > { %s2333_s28 = scalar_lea.vmem [#allocation2], %s1690_s1 }
  0x42   : > { %2109 = dma.done.wait (%p2288_p11), %s327_s2, 256  }
  0x43   : > { %2111 = vsyncadd (%p2288_p11), %s327_s2, 4294967040 }
  0x44   : > { %2113 = dma.done.wait (%p47_p1), [#allocation6], 12384  }
  0x45   : > { %2115 = vsyncadd (%p47_p1), [#allocation6], 4294954912 }
  0x46   : > { %2117 = dma.done.wait (%p47_p1), [#allocation9], 24576  }
  0x47   : > { %2119 = vsyncadd (%p47_p1), [#allocation9], 4294942720 }
  0x48   : > { %2121 = dma.done.wait (%p47_p1), [#allocation12], 192  }
  0x49   : > { %2123 = vsyncadd (%p47_p1), [#allocation12], 4294967104  ;;  %v486_v0 = vld [vmem:[#allocation5 + $0x2d0] sm:$0xff]  ;;  %v487_v1 = vld [vmem:[#allocation5 + $0x2d8] sm:$0xff]  ;;  %s1735_s9 = smul.u32 96, %s2329_s16  ;;  %s2084_s1 = scalar_lea.hbm %s3366_s7, 384 }
  0x4a   : > { %v488_v2 = vld [vmem:[#allocation5 + $0x2e0] sm:$0xff]  ;;  %506 = vmatpush.msra.mxu0 %v486_v0  ;;  %529 = vmatpush.msra.mxu1 %v487_v1  ;;  %v489_v3 = vld [vmem:[#allocation5 + $0x2e8] sm:$0xff]  ;;  %v482_v6 = vld [vmem:[#allocation5 + $0x2b0] sm:$0xff]  ;;  %s1736_s21 = smul.u32 96, %s2220_s8  ;;  %s1531_s8 = scalar_lea.sflag [#allocation4], %s2329_s16 }
  0x4b   : > { %v480_v4 = vld [vmem:[#allocation5 + $0x2a0] sm:$0xff]  ;;  %v481_v5 = vld [vmem:[#allocation5 + $0x2a8] sm:$0xff]  ;;  %552 = vmatpush.msra.mxu2 %v488_v2  ;;  %575 = vmatpush.msra.mxu3 %v489_v3  ;;  %v483_v7 = vld [vmem:[#allocation5 + $0x2b8] sm:$0xff]  ;;  %s3292_s20 = scalar_lea.vmem [#allocation14], %s1735_s9 }
  0x4c   : > { %v474_v8 = vld [vmem:[#allocation5 + $0x270] sm:$0xff]  ;;  %507 = vmatpush.msra.mxu0 %v480_v4  ;;  %530 = vmatpush.msra.mxu1 %v481_v5  ;;  %v475_v9 = vld [vmem:[#allocation5 + $0x278] sm:$0xff]  ;;  %v476_v10 = vld [vmem:[#allocation5 + $0x280] sm:$0xff]  ;;  %s1543_s13 = scalar_lea.hbm %s3366_s7, %s1736_s21  ;;  %s1544_s10 = sshll.u32 %s3292_s20, 4  ;;  %s1545_s10 = int_to_ptr.vmem [resolvable:$true] %s1544_s10 }
  0x4d   : > { %v477_v11 = vld [vmem:[#allocation5 + $0x288] sm:$0xff]  ;;  %553 = vmatpush.msra.mxu2 %v482_v6  ;;  %576 = vmatpush.msra.mxu3 %v483_v7  ;;  %v468_v12 = vld [vmem:[#allocation5 + $0x240] sm:$0xff]  ;;  %v470_v14 = vld [vmem:[#allocation5 + $0x250] sm:$0xff]  ;;  %s1546_s12 = sshll.u32 %s1543_s13, 4  ;;  %s1547_s12 = int_to_ptr.hbm [resolvable:$true] %s1546_s12 }
  0x4e   : > { %v469_v13 = vld [vmem:[#allocation5 + $0x248] sm:$0xff]  ;;  %508 = vmatpush.msra.mxu0 %v474_v8  ;;  %531 = vmatpush.msra.mxu1 %v475_v9  ;;  %v471_v15 = vld [vmem:[#allocation5 + $0x258] sm:$0xff]  ;;  %v462_v16 = vld [vmem:[#allocation5 + $0x210] sm:$0xff]  ;;  %s2078_s30 = sshra.s32 %s1547_s12, 4  ;;  %s2079_s30 = int_to_ptr.hbm [resolvable:$true] %s2078_s30 }
  0x4f   : > { %554 = vmatpush.msra.mxu2 %v476_v10  ;;  %577 = vmatpush.msra.mxu3 %v477_v11  ;;  %v463_v17 = vld [vmem:[#allocation5 + $0x218] sm:$0xff]  ;;  %v464_v18 = vld [vmem:[#allocation5 + $0x220] sm:$0xff]  ;;  %v465_v19 = vld [vmem:[#allocation5 + $0x228] sm:$0xff]  ;;  %s2080_s19 = scalar_lea.hbm %s2079_s30, 96  ;;  %p2085_p5 = scmp.lt.s32.totalorder %s2079_s30, %s3366_s7 }
  0x50   : > { %509 = vmatpush.msra.mxu0 %v468_v12  ;;  %532 = vmatpush.msra.mxu1 %v469_v13  ;;  %v456_v20 = vld [vmem:[#allocation5 + $0x1e0] sm:$0xff]  ;;  %v457_v21 = vld [vmem:[#allocation5 + $0x1e8] sm:$0xff]  ;;  %v458_v22 = vld [vmem:[#allocation5 + $0x1f0] sm:$0xff]  ;;  %p2081_p1 = scmp.ne.s32.totalorder %s2079_s30, %s2080_s19  ;;  %p2086_p6 = scmp.lt.s32.totalorder %s2084_s1, %s2080_s19 }
  0x51   : > { %555 = vmatpush.msra.mxu2 %v470_v14  ;;  %578 = vmatpush.msra.mxu3 %v471_v15  ;;  %v459_v23 = vld [vmem:[#allocation5 + $0x1f8] sm:$0xff]  ;;  %v450_v24 = vld [vmem:[#allocation5 + $0x1b0] sm:$0xff]  ;;  %v452_v26 = vld [vmem:[#allocation5 + $0x1c0] sm:$0xff] }
  0x52   : > { %510 = vmatpush.msra.mxu0 %v462_v16  ;;  %533 = vmatpush.msra.mxu1 %v463_v17  ;;  %v451_v25 = vld [vmem:[#allocation5 + $0x1b8] sm:$0xff]  ;;  %v453_v27 = vld [vmem:[#allocation5 + $0x1c8] sm:$0xff]  ;;  %v444_v28 = vld [vmem:[#allocation5 + $0x180] sm:$0xff]  ;;  %p2082_p3 = pnand %p2081_p1, %p2295_p2  ;;  %p2087_p7 = por %p2086_p6, %p2085_p5 }
  0x53   : > { %556 = vmatpush.msra.mxu2 %v464_v18  ;;  %579 = vmatpush.msra.mxu3 %v465_v19  ;;  %v445_v29 = vld [vmem:[#allocation5 + $0x188] sm:$0xff]  ;;  %v446_v30 = vld [vmem:[#allocation5 + $0x190] sm:$0xff]  ;;  %v447_v31 = vld [vmem:[#allocation5 + $0x198] sm:$0xff] }
  0x54   : > { %511 = vmatpush.msra.mxu0 %v456_v20  ;;  %534 = vmatpush.msra.mxu1 %v457_v21  ;;  %v438_v32 = vld [vmem:[#allocation5 + $0x150] sm:$0xff]  ;;  %v439_v33 = vld [vmem:[#allocation5 + $0x158] sm:$0xff]  ;;  %v440_v34 = vld [vmem:[#allocation5 + $0x160] sm:$0xff]  ;;  %p2083_p11 = pneg %p2082_p3 }
  0x55   : > { %557 = vmatpush.msra.mxu2 %v458_v22  ;;  %580 = vmatpush.msra.mxu3 %v459_v23  ;;  %v441_v35 = vld [vmem:[#allocation5 + $0x168] sm:$0xff]  ;;  %v432_v36 = vld [vmem:[#allocation5 + $0x120] sm:$0xff]  ;;  %v434_v38 = vld [vmem:[#allocation5 + $0x130] sm:$0xff] }
  0x56   : > { %512 = vmatpush.msra.mxu0 %v450_v24  ;;  %535 = vmatpush.msra.mxu1 %v451_v25  ;;  %v433_v37 = vld [vmem:[#allocation5 + $0x128] sm:$0xff]  ;;  %v435_v39 = vld [vmem:[#allocation5 + $0x138] sm:$0xff]  ;;  %v426_v40 = vld [vmem:[#allocation5 + $0xf0] sm:$0xff]  ;;  %p2088_p8 = pnand %p2087_p7, %p2083_p11 }
  0x57   : > { %558 = vmatpush.msra.mxu2 %v452_v26  ;;  %581 = vmatpush.msra.mxu3 %v453_v27  ;;  %v427_v41 = vld [vmem:[#allocation5 + $0xf8] sm:$0xff]  ;;  %v428_v42 = vld [vmem:[#allocation5 + $0x100] sm:$0xff]  ;;  %v429_v43 = vld [vmem:[#allocation5 + $0x108] sm:$0xff] }
  0x58   : > { %513 = vmatpush.msra.mxu0 %v444_v28  ;;  %536 = vmatpush.msra.mxu1 %v445_v29  ;;  %v420_v44 = vld [vmem:[#allocation5 + $0xc0] sm:$0xff]  ;;  %v421_v45 = vld [vmem:[#allocation5 + $0xc8] sm:$0xff]  ;;  %v422_v46 = vld [vmem:[#allocation5 + $0xd0] sm:$0xff] }
  0x59   : > { %559 = vmatpush.msra.mxu2 %v446_v30  ;;  %582 = vmatpush.msra.mxu3 %v447_v31  ;;  %v423_v47 = vld [vmem:[#allocation5 + $0xd8] sm:$0xff]  ;;  %v414_v48 = vld [vmem:[#allocation5 + $0x90] sm:$0xff]  ;;  %v416_v50 = vld [vmem:[#allocation5 + $0xa0] sm:$0xff] }
  0x5a   : > { %514 = vmatpush.msra.mxu0 %v438_v32  ;;  %537 = vmatpush.msra.mxu1 %v439_v33  ;;  %v415_v49 = vld [vmem:[#allocation5 + $0x98] sm:$0xff]  ;;  %v417_v51 = vld [vmem:[#allocation5 + $0xa8] sm:$0xff]  ;;  %v408_v52 = vld [vmem:[#allocation5 + $0x60] sm:$0xff] }
  0x5b   : > { %560 = vmatpush.msra.mxu2 %v440_v34  ;;  %583 = vmatpush.msra.mxu3 %v441_v35  ;;  %v409_v53 = vld [vmem:[#allocation5 + $0x68] sm:$0xff]  ;;  %v410_v54 = vld [vmem:[#allocation5 + $0x70] sm:$0xff]  ;;  %v411_v55 = vld [vmem:[#allocation5 + $0x78] sm:$0xff] }
  0x5c   : > { %515 = vmatpush.msra.mxu0 %v432_v36  ;;  %538 = vmatpush.msra.mxu1 %v433_v37  ;;  %v402_v56 = vld [vmem:[#allocation5 + $0x30] sm:$0xff]  ;;  %v403_v57 = vld [vmem:[#allocation5 + $0x38] sm:$0xff]  ;;  %v404_v58 = vld [vmem:[#allocation5 + $0x40] sm:$0xff] }
  0x5d   : > { %561 = vmatpush.msra.mxu2 %v434_v38  ;;  %584 = vmatpush.msra.mxu3 %v435_v39  ;;  %v405_v59 = vld [vmem:[#allocation5 + $0x48] sm:$0xff]  ;;  %v396_v60 = vld [vmem:[#allocation5] sm:$0xff]  ;;  %v398_v62 = vld [vmem:[#allocation5 + $0x10] sm:$0xff] }
  0x5e   : > { %516 = vmatpush.msra.mxu0 %v426_v40  ;;  %539 = vmatpush.msra.mxu1 %v427_v41  ;;  %v397_v61 = vld [vmem:[#allocation5 + $0x8] sm:$0xff]  ;;  %v399_v63 = vld [vmem:[#allocation5 + $0x18] sm:$0xff]  ;;  %v2352_v0 = vld [vmem:[%s2333_s28] sm:$0xff] }
  0x5f   : > { %562 = vmatpush.msra.mxu2 %v428_v42  ;;  %585 = vmatpush.msra.mxu3 %v429_v43  ;;  %v490_v1 = vld [vmem:[#allocation5 + $0x2f0] sm:$0xff]  ;;  %v491_v2 = vld [vmem:[#allocation5 + $0x2f8] sm:$0xff]  ;;  %v484_v3 = vld [vmem:[#allocation5 + $0x2c0] sm:$0xff] }
  0x60   : > { %517 = vmatpush.msra.mxu0 %v420_v44  ;;  %540 = vmatpush.msra.mxu1 %v421_v45  ;;  %v485_v4 = vld [vmem:[#allocation5 + $0x2c8] sm:$0xff]  ;;  %v478_v5 = vld [vmem:[#allocation5 + $0x290] sm:$0xff]  ;;  %v479_v6 = vld [vmem:[#allocation5 + $0x298] sm:$0xff] }
  0x61   : > { %563 = vmatpush.msra.mxu2 %v422_v46  ;;  %586 = vmatpush.msra.mxu3 %v423_v47  ;;  %v472_v7 = vld [vmem:[#allocation5 + $0x260] sm:$0xff]  ;;  %v473_v8 = vld [vmem:[#allocation5 + $0x268] sm:$0xff]  ;;  %v466_v10 = vld [vmem:[#allocation5 + $0x230] sm:$0xff] }
  0x62   : > { %518 = vmatpush.msra.mxu0 %v414_v48  ;;  %541 = vmatpush.msra.mxu1 %v415_v49  ;;  %v2359_v9 = vld [vmem:[%s2333_s28 + $0x8] sm:$0xff]  ;;  %v460_v12 = vld [vmem:[#allocation5 + $0x200] sm:$0xff]  ;;  %v454_v14 = vld [vmem:[#allocation5 + $0x1d0] sm:$0xff] }
  0x63   : > { %564 = vmatpush.msra.mxu2 %v416_v50  ;;  %587 = vmatpush.msra.mxu3 %v417_v51  ;;  %v467_v11 = vld [vmem:[#allocation5 + $0x238] sm:$0xff]  ;;  %v461_v13 = vld [vmem:[#allocation5 + $0x208] sm:$0xff]  ;;  %v448_v18 = vld [vmem:[#allocation5 + $0x1a0] sm:$0xff] }
  0x64   : > { %519 = vmatpush.msra.mxu0 %v408_v52  ;;  %542 = vmatpush.msra.mxu1 %v409_v53  ;;  %v455_v15 = vld [vmem:[#allocation5 + $0x1d8] sm:$0xff]  ;;  %v449_v19 = vld [vmem:[#allocation5 + $0x1a8] sm:$0xff]  ;;  %v442_v21 = vld [vmem:[#allocation5 + $0x170] sm:$0xff] }
  0x65   : > { %565 = vmatpush.msra.mxu2 %v410_v54  ;;  %588 = vmatpush.msra.mxu3 %v411_v55  ;;  %v2365_v16 = vld [vmem:[#allocation8 + $0x78] sm:$0xff]  ;;  %v2371_v20 = vld [vmem:[#allocation8 + $0x70] sm:$0xff]  ;;  %v2377_v24 = vld [vmem:[#allocation8 + $0x68] sm:$0xff] }
  0x66   : > { %520 = vmatpush.msra.mxu0 %v402_v56  ;;  %543 = vmatpush.msra.mxu1 %v403_v57  ;;  %v2367_v17 = vld [vmem:[#allocation8 + $0xf8] sm:$0xff]  ;;  %v2373_v22 = vld [vmem:[#allocation8 + $0xf0] sm:$0xff]  ;;  %v2379_v25 = vld [vmem:[#allocation8 + $0xe8] sm:$0xff] }
  0x67   : > { %566 = vmatpush.msra.mxu2 %v404_v58  ;;  %589 = vmatpush.msra.mxu3 %v405_v59  ;;  %v443_v23 = vld [vmem:[#allocation5 + $0x178] sm:$0xff]  ;;  %v2381_v26 = vld [vmem:[#allocation8 + $0x60] sm:$0xff]  ;;  %v430_v32 = vld [vmem:[#allocation5 + $0x110] sm:$0xff] }
  0x68   : > { %521 = vmatpush.msra.mxu0 %v396_v60  ;;  %544 = vmatpush.msra.mxu1 %v397_v61  ;;  %v2383_v27 = vld [vmem:[#allocation8 + $0xe0] sm:$0xff]  ;;  %v2387_v30 = vld [vmem:[#allocation8 + $0x58] sm:$0xff]  ;;  %v2393_v34 = vld [vmem:[#allocation8 + $0x50] sm:$0xff] }
  0x69   : > { %567 = vmatpush.msra.mxu2 %v398_v62  ;;  %590 = vmatpush.msra.mxu3 %v399_v63  ;;  %v436_v28 = vld [vmem:[#allocation5 + $0x140] sm:$0xff]  ;;  %v437_v29 = vld [vmem:[#allocation5 + $0x148] sm:$0xff]  ;;  %v431_v33 = vld [vmem:[#allocation5 + $0x118] sm:$0xff] }
  0x6a   : > { %568 = vmatmul.f32.vlgmr.msra.gmra.mxu2 %v2352_v0  ;;  %591 = vmatmul.f32.vlgmr.msra.gmra.mxu3 %v2352_v0  ;;  %v2389_v31 = vld [vmem:[#allocation8 + $0xd8] sm:$0xff]  ;;  %v2395_v35 = vld [vmem:[#allocation8 + $0xd0] sm:$0xff]  ;;  %v425_v37 = vld [vmem:[#allocation5 + $0xe8] sm:$0xff] }
  0x6b   : > { %598 = vmatpush.msrb.mxu0 %v490_v1  ;;  %621 = vmatpush.msrb.mxu1 %v491_v2  ;;  %v424_v36 = vld [vmem:[#allocation5 + $0xe0] sm:$0xff]  ;;  %v2399_v38 = vld [vmem:[#allocation8 + $0x48] sm:$0xff]  ;;  %v419_v41 = vld [vmem:[#allocation5 + $0xb8] sm:$0xff] }
  0x6c   : > { %522 = vmatmul.f32.vlgmr.msra.gmra.mxu0 %v2352_v0  ;;  %545 = vmatmul.f32.vlgmr.msra.gmra.mxu1 %v2352_v0  ;;  %v2401_v39 = vld [vmem:[#allocation8 + $0xc8] sm:$0xff]  ;;  %v2405_v42 = vld [vmem:[#allocation8 + $0x40] sm:$0xff]  ;;  %v2411_v46 = vld [vmem:[#allocation8 + $0x38] sm:$0xff] }
  0x6d   : > { %599 = vmatpush.msrb.mxu0 %v484_v3  ;;  %622 = vmatpush.msrb.mxu1 %v485_v4  ;;  %v418_v40 = vld [vmem:[#allocation5 + $0xb0] sm:$0xff]  ;;  %v2407_v43 = vld [vmem:[#allocation8 + $0xc0] sm:$0xff]  ;;  %v2413_v47 = vld [vmem:[#allocation8 + $0xb8] sm:$0xff] }
  0x6e   : > { %752 = vmatpush.msrb.mxu2 %v2365_v16  ;;  %775 = vmatpush.msrb.mxu3 %v2367_v17  ;;  %v412_v44 = vld [vmem:[#allocation5 + $0x80] sm:$0xff]  ;;  %v413_v45 = vld [vmem:[#allocation5 + $0x88] sm:$0xff]  ;;  %v406_v48 = vld [vmem:[#allocation5 + $0x50] sm:$0xff] }
  0x6f   : > { %600 = vmatpush.msrb.mxu0 %v478_v5  ;;  %623 = vmatpush.msrb.mxu1 %v479_v6  ;;  %v407_v49 = vld [vmem:[#allocation5 + $0x58] sm:$0xff]  ;;  %v400_v52 = vld [vmem:[#allocation5 + $0x20] sm:$0xff]  ;;  %v401_v53 = vld [vmem:[#allocation5 + $0x28] sm:$0xff] }
  0x70   : > { %753 = vmatpush.msrb.mxu2 %v2371_v20  ;;  %776 = vmatpush.msrb.mxu3 %v2373_v22  ;;  %v2417_v50 = vld [vmem:[#allocation8 + $0x30] sm:$0xff]  ;;  %v2423_v54 = vld [vmem:[#allocation8 + $0x178] sm:$0xff]  ;;  %v2429_v56 = vld [vmem:[#allocation8 + $0x28] sm:$0xff] }
  0x71   : > { %601 = vmatpush.msrb.mxu0 %v472_v7  ;;  %624 = vmatpush.msrb.mxu1 %v473_v8  ;;  %v2419_v51 = vld [vmem:[#allocation8 + $0xb0] sm:$0xff]  ;;  %v2425_v55 = vld [vmem:[#allocation8 + $0x1f8] sm:$0xff]  ;;  %v2431_v57 = vld [vmem:[#allocation8 + $0xa8] sm:$0xff] }
  0x72   : > { %571 = vmatmul.f32.gmra.mxu2 %v2359_v9  ;;  %594 = vmatmul.f32.gmra.mxu3 %v2359_v9  ;;  %v2435_v58 = vld [vmem:[#allocation8 + $0x170] sm:$0xff]  ;;  %v2441_v60 = vld [vmem:[#allocation8 + $0x20] sm:$0xff]  ;;  %v2445_v62 = vld [vmem:[#allocation8 + $0x168] sm:$0xff] }
  0x73   : > { %602 = vmatpush.msrb.mxu0 %v466_v10  ;;  %625 = vmatpush.msrb.mxu1 %v467_v11  ;;  %v2437_v59 = vld [vmem:[#allocation8 + $0x1f0] sm:$0xff]  ;;  %v2443_v61 = vld [vmem:[#allocation8 + $0xa0] sm:$0xff]  ;;  %v2447_v63 = vld [vmem:[#allocation8 + $0x1e8] sm:$0xff] }
  0x74   : > { %525 = vmatmul.f32.gmra.mxu0 %v2359_v9  ;;  %548 = vmatmul.f32.gmra.mxu1 %v2359_v9  ;;  %v2455_v1 = vld [vmem:[#allocation8 + $0x98] sm:$0xff]  ;;  %v2457_v2 = vld [vmem:[#allocation8 + $0x160] sm:$0xff]  ;;  %v2473_v6 = vld [vmem:[#allocation8 + $0x10] sm:$0xff] }
  0x75   : > { %603 = vmatpush.msrb.mxu0 %v460_v12  ;;  %626 = vmatpush.msrb.mxu1 %v461_v13  ;;  %v2459_v3 = vld [vmem:[#allocation8 + $0x1e0] sm:$0xff]  ;;  %v2465_v4 = vld [vmem:[#allocation8 + $0x158] sm:$0xff]  ;;  %v2475_v7 = vld [vmem:[#allocation8 + $0x90] sm:$0xff] }
  0x76   : > { %754 = vmatpush.msrb.mxu2 %v2377_v24  ;;  %777 = vmatpush.msrb.mxu3 %v2379_v25  ;;  %v2467_v5 = vld [vmem:[#allocation8 + $0x1d8] sm:$0xff]  ;;  %v2479_v8 = vld [vmem:[#allocation8 + $0x150] sm:$0xff]  ;;  %v2485_v11 = vld [vmem:[#allocation8 + $0x8] sm:$0xff] }
  0x77   : > { %604 = vmatpush.msrb.mxu0 %v454_v14  ;;  %627 = vmatpush.msrb.mxu1 %v455_v15  ;;  %3447 = vst [vmem:[#allocation20_spill] sm:$0xff] %v2479_v8  ;;  %v2481_v10 = vld [vmem:[#allocation8 + $0x1d0] sm:$0xff]  ;;  %v2487_v12 = vld [vmem:[#allocation8 + $0x88] sm:$0xff]  ;;  %v2499_v15 = vld [vmem:[#allocation8 + $0x80] sm:$0xff] }
  0x78   : > { %755 = vmatpush.msrb.mxu2 %v2381_v26  ;;  %778 = vmatpush.msrb.mxu3 %v2383_v27  ;;  %3448 = vst [vmem:[#allocation21_spill] sm:$0xff] %v2481_v10  ;;  %v2489_v13 = vld [vmem:[#allocation8 + $0x148] sm:$0xff] }
  0x79   : > { %605 = vmatpush.msrb.mxu0 %v448_v18  ;;  %628 = vmatpush.msrb.mxu1 %v449_v19  ;;  %3449 = vst [vmem:[#allocation22_spill] sm:$0xff] %v2489_v13  ;;  %v2491_v14 = vld [vmem:[#allocation8 + $0x1c8] sm:$0xff]  ;;  %v2501_v18 = vld [vmem:[#allocation8 + $0x140] sm:$0xff] }
  0x7a   : > { %756 = vmatpush.msrb.mxu2 %v2387_v30  ;;  %779 = vmatpush.msrb.mxu3 %v2389_v31  ;;  %3450 = vst [vmem:[#allocation23_spill] sm:$0xff] %v2491_v14  ;;  %v2503_v19 = vld [vmem:[#allocation8 + $0x1c0] sm:$0xff] }
  0x7b   : > { %606 = vmatpush.msrb.mxu0 %v442_v21  ;;  %629 = vmatpush.msrb.mxu1 %v443_v23  ;;  %3451 = vst [vmem:[#allocation24_spill] sm:$0xff] %v2501_v18  ;;  %v2509_v21 = vld [vmem:[#allocation8 + $0x278] sm:$0xff] }
  0x7c   : > { %757 = vmatpush.msrb.mxu2 %v2393_v34  ;;  %780 = vmatpush.msrb.mxu3 %v2395_v35  ;;  %3452 = vst [vmem:[#allocation25_spill] sm:$0xff] %v2503_v19  ;;  %v2511_v23 = vld [vmem:[#allocation8 + $0x2f8] sm:$0xff] }
  0x7d   : > { %607 = vmatpush.msrb.mxu0 %v436_v28  ;;  %630 = vmatpush.msrb.mxu1 %v437_v29  ;;  %v2513_v28 = vld [vmem:[#allocation8 + $0x138] sm:$0xff] }
  0x7e   : > { %758 = vmatpush.msrb.mxu2 %v2399_v38  ;;  %781 = vmatpush.msrb.mxu3 %v2401_v39  ;;  %3453 = vst [vmem:[#allocation26_spill] sm:$0xff] %v2513_v28  ;;  %v2515_v29 = vld [vmem:[#allocation8 + $0x1b8] sm:$0xff] }
  0x7f   : > { %608 = vmatpush.msrb.mxu0 %v430_v32  ;;  %631 = vmatpush.msrb.mxu1 %v431_v33  ;;  %3454 = vst [vmem:[#allocation27_spill] sm:$0xff] %v2515_v29  ;;  %v2521_v32 = vld [vmem:[#allocation8 + $0x270] sm:$0xff] }
  0x80   : > { %759 = vmatpush.msrb.mxu2 %v2405_v42  ;;  %782 = vmatpush.msrb.mxu3 %v2407_v43  ;;  %v2523_v33 = vld [vmem:[#allocation8 + $0x2f0] sm:$0xff] }
  0x81   : > { %609 = vmatpush.msrb.mxu0 %v424_v36  ;;  %632 = vmatpush.msrb.mxu1 %v425_v37  ;;  %v2525_v36 = vld [vmem:[#allocation8 + $0x130] sm:$0xff] }
  0x82   : > { %760 = vmatpush.msrb.mxu2 %v2411_v46  ;;  %783 = vmatpush.msrb.mxu3 %v2413_v47  ;;  %3455 = vst [vmem:[#allocation28_spill] sm:$0xff] %v2525_v36  ;;  %v2527_v37 = vld [vmem:[#allocation8 + $0x1b0] sm:$0xff] }
  0x83   : > { %610 = vmatpush.msrb.mxu0 %v418_v40  ;;  %633 = vmatpush.msrb.mxu1 %v419_v41  ;;  %3456 = vst [vmem:[#allocation29_spill] sm:$0xff] %v2527_v37  ;;  %v2533_v40 = vld [vmem:[#allocation8 + $0x268] sm:$0xff] }
  0x84   : > { %761 = vmatpush.msrb.mxu2 %v2417_v50  ;;  %784 = vmatpush.msrb.mxu3 %v2419_v51  ;;  %v2535_v41 = vld [vmem:[#allocation8 + $0x2e8] sm:$0xff] }
  0x85   : > { %611 = vmatpush.msrb.mxu0 %v412_v44  ;;  %634 = vmatpush.msrb.mxu1 %v413_v45  ;;  %v2537_v44 = vld [vmem:[#allocation8 + $0x128] sm:$0xff] }
  0x86   : > { %762 = vmatpush.msrb.mxu2 %v2429_v56  ;;  %785 = vmatpush.msrb.mxu3 %v2431_v57  ;;  %3457 = vst [vmem:[#allocation30_spill] sm:$0xff] %v2537_v44  ;;  %v2539_v45 = vld [vmem:[#allocation8 + $0x1a8] sm:$0xff] }
  0x87   : > { %612 = vmatpush.msrb.mxu0 %v406_v48  ;;  %635 = vmatpush.msrb.mxu1 %v407_v49  ;;  %3458 = vst [vmem:[#allocation31_spill] sm:$0xff] %v2539_v45  ;;  %v2545_v48 = vld [vmem:[#allocation8 + $0x260] sm:$0xff] }
  0x88   : > { %763 = vmatpush.msrb.mxu2 %v2441_v60  ;;  %786 = vmatpush.msrb.mxu3 %v2443_v61  ;;  %v2547_v49 = vld [vmem:[#allocation8 + $0x2e0] sm:$0xff] }
  0x89   : > { %613 = vmatpush.msrb.mxu0 %v400_v52  ;;  %636 = vmatpush.msrb.mxu1 %v401_v53  ;;  %v2549_v52 = vld [vmem:[#allocation8 + $0x120] sm:$0xff] }
  0x8a   : > { %614 = vmatmul.f32.vlgmr.msrb.gmra.mxu0 %v2352_v0  ;;  %637 = vmatmul.f32.vlgmr.msrb.gmra.mxu1 %v2352_v0  ;;  %v2453_v0 = vld [vmem:[#allocation8 + $0x18] sm:$0xff]  ;;  %3459 = vst [vmem:[#allocation32_spill] sm:$0xff] %v2549_v52  ;;  %v2551_v53 = vld [vmem:[#allocation8 + $0x1a0] sm:$0xff] }
  0x8b   : > { %798 = vmatpush.msra.mxu0 %v2423_v54  ;;  %821 = vmatpush.msra.mxu1 %v2425_v55  ;;  %3460 = vst [vmem:[#allocation33_spill] sm:$0xff] %v2551_v53 }
  0x8c   : > { %764 = vmatpush.msrb.mxu2 %v2453_v0  ;;  %787 = vmatpush.msrb.mxu3 %v2455_v1 }
  0x8d   : > { %799 = vmatpush.msra.mxu0 %v2435_v58  ;;  %822 = vmatpush.msra.mxu1 %v2437_v59 }
  0x8e   : > { %765 = vmatpush.msrb.mxu2 %v2473_v6  ;;  %788 = vmatpush.msrb.mxu3 %v2475_v7 }
  0x8f   : > { %800 = vmatpush.msra.mxu0 %v2445_v62  ;;  %823 = vmatpush.msra.mxu1 %v2447_v63 }
  0x90   : > { %766 = vmatpush.msrb.mxu2 %v2485_v11  ;;  %789 = vmatpush.msrb.mxu3 %v2487_v12 }
  0x91   : > { %801 = vmatpush.msra.mxu0 %v2457_v2  ;;  %824 = vmatpush.msra.mxu1 %v2459_v3 }
  0x92   : > { %617 = vmatmul.f32.gmra.mxu0 %v2359_v9  ;;  %640 = vmatmul.f32.gmra.mxu1 %v2359_v9  ;;  %v2497_v9 = vld [vmem:[#allocation8] sm:$0xff] }
  0x93   : > { %802 = vmatpush.msra.mxu0 %v2465_v4  ;;  %825 = vmatpush.msra.mxu1 %v2467_v5 }
  0x94   : > { %767 = vmatpush.msrb.mxu2 %v2497_v9  ;;  %790 = vmatpush.msrb.mxu3 %v2499_v15 }
  0x95   : > { %803 = vmatpush.msra.mxu0 %v2479_v8  ;;  %826 = vmatpush.msra.mxu1 %v2481_v10  ;;  %v2593_v10 = vld [vmem:[#allocation8 + $0x240] sm:$0xff] }
  0x96   : > { %844 = vmatpush.msra.mxu2 %v2509_v21  ;;  %867 = vmatpush.msra.mxu3 %v2511_v23  ;;  %v2599_v8 = vld [vmem:[#allocation8 + $0x180] sm:$0xff] }
  0x97   : > { %804 = vmatpush.msra.mxu0 %v2489_v13  ;;  %827 = vmatpush.msra.mxu1 %v2491_v14  ;;  %v2581_v14 = vld [vmem:[#allocation8 + $0x248] sm:$0xff]  ;;  %3463 = vst [vmem:[#allocation36_spill] sm:$0xff] %v2599_v8 }
  0x98   : > { %845 = vmatpush.msra.mxu2 %v2521_v32  ;;  %868 = vmatpush.msra.mxu3 %v2523_v33  ;;  %v2587_v13 = vld [vmem:[#allocation8 + $0x188] sm:$0xff] }
  0x99   : > { %805 = vmatpush.msra.mxu0 %v2501_v18  ;;  %828 = vmatpush.msra.mxu1 %v2503_v19  ;;  %v2569_v19 = vld [vmem:[#allocation8 + $0x250] sm:$0xff] }
  0x9a   : > { %846 = vmatpush.msra.mxu2 %v2533_v40  ;;  %869 = vmatpush.msra.mxu3 %v2535_v41  ;;  %v2575_v18 = vld [vmem:[#allocation8 + $0x190] sm:$0xff] }
  0x9b   : > { %806 = vmatpush.msra.mxu0 %v2513_v28  ;;  %829 = vmatpush.msra.mxu1 %v2515_v29  ;;  %v2557_v29 = vld [vmem:[#allocation8 + $0x258] sm:$0xff] }
  0x9c   : > { %v2563_v28 = vld [vmem:[#allocation8 + $0x198] sm:$0xff]  ;;  %847 = vmatpush.msra.mxu2 %v2545_v48  ;;  %870 = vmatpush.msra.mxu3 %v2547_v49 }
  0x9d   : > { %807 = vmatpush.msra.mxu0 %v2525_v36  ;;  %830 = vmatpush.msra.mxu1 %v2527_v37  ;;  %v2559_v36 = vld [vmem:[#allocation8 + $0x2d8] sm:$0xff]  ;;  %3462 = vst [vmem:[#allocation35_spill] sm:$0xff] %v2563_v28 }
  0x9e   : > { %v2561_v37 = vld [vmem:[#allocation8 + $0x118] sm:$0xff]  ;;  %848 = vmatpush.msra.mxu2 %v2557_v29  ;;  %871 = vmatpush.msra.mxu3 %v2559_v36 }
  0x9f   : > { %808 = vmatpush.msra.mxu0 %v2537_v44  ;;  %831 = vmatpush.msra.mxu1 %v2539_v45  ;;  %3461 = vst [vmem:[#allocation34_spill] sm:$0xff] %v2561_v37  ;;  %v2571_v44 = vld [vmem:[#allocation8 + $0x2d0] sm:$0xff] }
  0xa0   : > { %v2573_v45 = vld [vmem:[#allocation8 + $0x110] sm:$0xff]  ;;  %849 = vmatpush.msra.mxu2 %v2569_v19  ;;  %872 = vmatpush.msra.mxu3 %v2571_v44 }
  0xa1   : > { %809 = vmatpush.msra.mxu0 %v2549_v52  ;;  %832 = vmatpush.msra.mxu1 %v2551_v53  ;;  %v2583_v52 = vld [vmem:[#allocation8 + $0x2c8] sm:$0xff] }
  0xa2   : > { %v2585_v53 = vld [vmem:[#allocation8 + $0x108] sm:$0xff]  ;;  %850 = vmatpush.msra.mxu2 %v2581_v14  ;;  %873 = vmatpush.msra.mxu3 %v2583_v52 }
  0xa3   : > { %810 = vmatpush.msra.mxu0 %v2561_v37  ;;  %833 = vmatpush.msra.mxu1 %v2563_v28  ;;  %v2595_v37 = vld [vmem:[#allocation8 + $0x2c0] sm:$0xff] }
  0xa4   : > { %v2597_v28 = vld [vmem:[#allocation8 + $0x100] sm:$0xff]  ;;  %851 = vmatpush.msra.mxu2 %v2593_v10  ;;  %874 = vmatpush.msra.mxu3 %v2595_v37 }
  0xa5   : > { %811 = vmatpush.msra.mxu0 %v2573_v45  ;;  %834 = vmatpush.msra.mxu1 %v2575_v18 }
  0xa7   : > { %812 = vmatpush.msra.mxu0 %v2585_v53  ;;  %835 = vmatpush.msra.mxu1 %v2587_v13 }
  0xa9   : > { %813 = vmatpush.msra.mxu0 %v2597_v28  ;;  %836 = vmatpush.msra.mxu1 %v2599_v8 }
  0xab   : > { %902 = vmatpush.msrb.mxu0 %v2365_v16  ;;  %925 = vmatpush.msrb.mxu1 %v2367_v17  ;;  %v2641_v16 = vld [vmem:[#allocation8 + $0x238] sm:$0xff] }
  0xac   : > { %v2643_v17 = vld [vmem:[#allocation8 + $0x2b8] sm:$0xff]  ;;  %852 = vmatpush.msra.mxu2 %v2641_v16 }
  0xad   : > { %903 = vmatpush.msrb.mxu0 %v2371_v20  ;;  %926 = vmatpush.msrb.mxu1 %v2373_v22  ;;  %v2647_v20 = vld [vmem:[#allocation8 + $0x230] sm:$0xff] }
  0xae   : > { %875 = vmatpush.msra.mxu3 %v2643_v17  ;;  %v2649_v22 = vld [vmem:[#allocation8 + $0x2b0] sm:$0xff]  ;;  %853 = vmatpush.msra.mxu2 %v2647_v20 }
  0xaf   : > { %904 = vmatpush.msrb.mxu0 %v2377_v24  ;;  %927 = vmatpush.msrb.mxu1 %v2379_v25  ;;  %v2653_v24 = vld [vmem:[#allocation8 + $0x228] sm:$0xff] }
  0xb0   : > { %876 = vmatpush.msra.mxu3 %v2649_v22  ;;  %v2655_v25 = vld [vmem:[#allocation8 + $0x2a8] sm:$0xff]  ;;  %854 = vmatpush.msra.mxu2 %v2653_v24 }
  0xb1   : > { %905 = vmatpush.msrb.mxu0 %v2381_v26  ;;  %928 = vmatpush.msrb.mxu1 %v2383_v27  ;;  %v2659_v26 = vld [vmem:[#allocation8 + $0x220] sm:$0xff] }
  0xb2   : > { %877 = vmatpush.msra.mxu3 %v2655_v25  ;;  %v2661_v27 = vld [vmem:[#allocation8 + $0x2a0] sm:$0xff]  ;;  %855 = vmatpush.msra.mxu2 %v2659_v26 }
  0xb3   : > { %906 = vmatpush.msrb.mxu0 %v2387_v30  ;;  %929 = vmatpush.msrb.mxu1 %v2389_v31  ;;  %v2665_v30 = vld [vmem:[#allocation8 + $0x218] sm:$0xff] }
  0xb4   : > { %878 = vmatpush.msra.mxu3 %v2661_v27  ;;  %v2667_v31 = vld [vmem:[#allocation8 + $0x298] sm:$0xff]  ;;  %856 = vmatpush.msra.mxu2 %v2665_v30 }
  0xb5   : > { %907 = vmatpush.msrb.mxu0 %v2393_v34  ;;  %930 = vmatpush.msrb.mxu1 %v2395_v35  ;;  %v2671_v34 = vld [vmem:[#allocation8 + $0x210] sm:$0xff] }
  0xb6   : > { %879 = vmatpush.msra.mxu3 %v2667_v31  ;;  %v2673_v35 = vld [vmem:[#allocation8 + $0x290] sm:$0xff]  ;;  %857 = vmatpush.msra.mxu2 %v2671_v34 }
  0xb7   : > { %908 = vmatpush.msrb.mxu0 %v2399_v38  ;;  %931 = vmatpush.msrb.mxu1 %v2401_v39  ;;  %v2677_v38 = vld [vmem:[#allocation8 + $0x208] sm:$0xff] }
  0xb8   : > { %880 = vmatpush.msra.mxu3 %v2673_v35  ;;  %v2679_v39 = vld [vmem:[#allocation8 + $0x288] sm:$0xff]  ;;  %858 = vmatpush.msra.mxu2 %v2677_v38 }
  0xb9   : > { %909 = vmatpush.msrb.mxu0 %v2405_v42  ;;  %932 = vmatpush.msrb.mxu1 %v2407_v43  ;;  %v2683_v42 = vld [vmem:[#allocation8 + $0x200] sm:$0xff] }
  0xba   : > { %881 = vmatpush.msra.mxu3 %v2679_v39  ;;  %v2685_v43 = vld [vmem:[#allocation8 + $0x280] sm:$0xff]  ;;  %859 = vmatpush.msra.mxu2 %v2683_v42 }
  0xbb   : > { %910 = vmatpush.msrb.mxu0 %v2411_v46  ;;  %933 = vmatpush.msrb.mxu1 %v2413_v47  ;;  %v2689_v46 = vld [vmem:[#allocation7] sm:$0x3f] }
  0xbc   : > { %882 = vmatpush.msra.mxu3 %v2685_v43  ;;  %v494_v47 = vperm.slane %v2689_v46, 0 }
  0xbd   : > { %911 = vmatpush.msrb.mxu0 %v2417_v50  ;;  %934 = vmatpush.msrb.mxu1 %v2419_v51  ;;  %v495_v50 = vperm.slane %v2689_v46, 1 }
  0xbf   : > { %912 = vmatpush.msrb.mxu0 %v2429_v56  ;;  %935 = vmatpush.msrb.mxu1 %v2431_v57  ;;  %v496_v57 = vperm.slane %v2689_v46, 2 }
  0xc1   : > { %913 = vmatpush.msrb.mxu0 %v2441_v60  ;;  %936 = vmatpush.msrb.mxu1 %v2443_v61  ;;  %v497_v60 = vperm.slane %v2689_v46, 3 }
  0xc3   : > { %914 = vmatpush.msrb.mxu0 %v2453_v0  ;;  %937 = vmatpush.msrb.mxu1 %v2455_v1 }
  0xc5   : > { %915 = vmatpush.msrb.mxu0 %v2473_v6  ;;  %938 = vmatpush.msrb.mxu1 %v2475_v7 }
  0xc7   : > { %916 = vmatpush.msrb.mxu0 %v2485_v11  ;;  %939 = vmatpush.msrb.mxu1 %v2487_v12 }
  0xc9   : > { %917 = vmatpush.msrb.mxu0 %v2497_v9  ;;  %940 = vmatpush.msrb.mxu1 %v2499_v15 }
  0xe9   : > { %v523_v51 = vpop.f32.mrf.mxu0  ;;  %v546_v56 = vpop.f32.mrf.mxu1 }
  0xea   : > { %v524_v61 = vadd.f32 %v523_v51, %v494_v47  ;;  %v547_v0 = vadd.f32 %v546_v56, %v495_v50 }
  0xec   : > { %v2695_v1 = vmax.f32 %v524_v61, 0.0  ;;  %v2697_v6 = vmax.f32 %v547_v0, 0.0 }
  0xed   : > { %v569_v7 = vpop.f32.mrf.mxu2  ;;  %v592_v11 = vpop.f32.mrf.mxu3 }
  0xee   : > { %3464 = vst [vmem:[#allocation37_spill] sm:$0xff] %v2695_v1  ;;  %v570_v12 = vadd.f32 %v569_v7, %v496_v57  ;;  %v593_v9 = vadd.f32 %v592_v11, %v497_v60  ;;  %768 = vmatmul.f32.vlgmr.msrb.gmra.mxu2 %v2695_v1  ;;  %791 = vmatmul.f32.vlgmr.msrb.gmra.mxu3 %v2697_v6 }
  0xef   : > { %3465 = vst [vmem:[#allocation38_spill] sm:$0xff] %v2697_v6  ;;  %948 = vmatpush.msrb.mxu2 %v2423_v54  ;;  %971 = vmatpush.msrb.mxu3 %v2425_v55 }
  0xf0   : > { %v2702_v15 = vmax.f32 %v570_v12, 0.0  ;;  %v2704_v8 = vmax.f32 %v593_v9, 0.0  ;;  %v2829_v12 = vld [vmem:[#allocation10 + $0x2e8] sm:$0xff]  ;;  %v2831_v9 = vld [vmem:[#allocation10 + $0x2a0] sm:$0xff] }
  0xf1   : > { %v526_v51 = vpop.f32.mrf.mxu0  ;;  %v549_v56 = vpop.f32.mrf.mxu1  ;;  %949 = vmatpush.msrb.mxu2 %v2435_v58  ;;  %972 = vmatpush.msrb.mxu3 %v2437_v59 }
  0xf2   : > { %3466 = vst [vmem:[#allocation39_spill] sm:$0xff] %v2702_v15  ;;  %814 = vmatmul.f32.vlgmr.msra.gmra.mxu0 %v2702_v15  ;;  %837 = vmatmul.f32.vlgmr.msra.gmra.mxu1 %v2704_v8  ;;  %v527_v61 = vadd.f32 %v526_v51, %v494_v47  ;;  %v550_v0 = vadd.f32 %v549_v56, %v495_v50  ;;  %v3491_v47 = vld [vmem:[#allocation35_spill] sm:$0xff]  ;;  %v2837_v56 = vld [vmem:[#allocation10 + $0x2b0] sm:$0xff] }
  0xf3   : > { %3467 = vst [vmem:[#allocation40_spill] sm:$0xff] %v2704_v8  ;;  %994 = vmatpush.msra.mxu0 %v2509_v21  ;;  %1017 = vmatpush.msra.mxu1 %v2511_v23  ;;  %v3473_v23 = vld [vmem:[#allocation21_spill] sm:$0xff]  ;;  %v892_v50 = vmul.f32 %v2702_v15, %v2702_v15  ;;  %v2833_v51 = vld [vmem:[#allocation10 + $0x2a8] sm:$0xff] }
  0xf4   : > { %v2712_v54 = vmax.f32 %v527_v61, 0.0  ;;  %950 = vmatpush.msrb.mxu2 %v2445_v62  ;;  %973 = vmatpush.msrb.mxu3 %v2447_v63  ;;  %v2726_v62 = vmax.f32 %v550_v0, 0.0  ;;  %v3472_v63 = vld [vmem:[#allocation20_spill] sm:$0xff]  ;;  %v2839_v61 = vld [vmem:[#allocation10 + $0x2b8] sm:$0xff] }
  0xf5   : > { %v572_v55 = vpop.f32.mrf.mxu2  ;;  %v595_v7 = vpop.f32.mrf.mxu3  ;;  %995 = vmatpush.msra.mxu0 %v2521_v32  ;;  %1018 = vmatpush.msra.mxu1 %v2523_v33  ;;  %v3478_v32 = vld [vmem:[#allocation26_spill] sm:$0xff]  ;;  %v2841_v0 = vld [vmem:[#allocation10 + $0x270] sm:$0xff]  ;;  %v2987_v15 = vld [vmem:[#allocation10 + $0x68] sm:$0xff] }
  0xf6   : > { %3468 = vst [vmem:[#allocation41_spill] sm:$0xff] %v2712_v54  ;;  %v573_v58 = vadd.f32 %v572_v55, %v496_v57  ;;  %v596_v11 = vadd.f32 %v595_v7, %v497_v60  ;;  %951 = vmatpush.msrb.mxu2 %v2457_v2  ;;  %974 = vmatpush.msrb.mxu3 %v2459_v3  ;;  %v2823_v57 = vld [vmem:[#allocation10 + $0x2d8] sm:$0xff]  ;;  %v2825_v60 = vld [vmem:[#allocation10 + $0x2e0] sm:$0xff] }
  0xf7   : > { %996 = vmatpush.msra.mxu0 %v2533_v40  ;;  %1019 = vmatpush.msra.mxu1 %v2535_v41  ;;  %3471 = vst [vmem:[#allocation44_spill] sm:$0xff] %v2726_v62  ;;  %v890_v2 = vmul.f32 %v2695_v1, %v2695_v1  ;;  %v891_v3 = vmul.f32 %v2697_v6, %v2697_v6  ;;  %v2845_v55 = vld [vmem:[#allocation10 + $0x278] sm:$0xff]  ;;  %v2847_v7 = vld [vmem:[#allocation10 + $0x280] sm:$0xff]  ;;  %v3005_v1 = vld [vmem:[#allocation10 + $0x48] sm:$0xff] }
  0xf8   : > { %v2722_v21 = vmax.f32 %v573_v58, 0.0  ;;  %v2724_v59 = vmax.f32 %v596_v11, 0.0  ;;  %771 = vmatmul.f32.gmra.mxu2 %v2712_v54  ;;  %794 = vmatmul.f32.gmra.mxu3 %v2726_v62  ;;  %v2849_v58 = vld [vmem:[#allocation10 + $0x288] sm:$0xff]  ;;  %v2857_v11 = vld [vmem:[#allocation10 + $0x240] sm:$0xff]  ;;  %3508 = vst [vmem:[#allocation47_spill] sm:$0xff] %v3005_v1 }
  0xf9   : > { %997 = vmatpush.msra.mxu0 %v2545_v48  ;;  %1020 = vmatpush.msra.mxu1 %v2547_v49  ;;  %v3479_v48 = vld [vmem:[#allocation27_spill] sm:$0xff]  ;;  %v3480_v49 = vld [vmem:[#allocation28_spill] sm:$0xff] }
  0xfa   : > { %3469 = vst [vmem:[#allocation42_spill] sm:$0xff] %v2722_v21  ;;  %817 = vmatmul.f32.gmra.mxu0 %v2722_v21  ;;  %840 = vmatmul.f32.gmra.mxu1 %v2724_v59  ;;  %v3003_v6 = vld [vmem:[#allocation10 + $0x40] sm:$0xff] }
  0xfb   : > { %3470 = vst [vmem:[#allocation43_spill] sm:$0xff] %v2724_v59  ;;  %998 = vmatpush.msra.mxu0 %v2557_v29  ;;  %1021 = vmatpush.msra.mxu1 %v2559_v36  ;;  %v3476_v29 = vld [vmem:[#allocation24_spill] sm:$0xff] }
  0xfc   : > { %952 = vmatpush.msrb.mxu2 %v2465_v4  ;;  %975 = vmatpush.msrb.mxu3 %v2467_v5  ;;  %v3474_v4 = vld [vmem:[#allocation22_spill] sm:$0xff]  ;;  %v498_v5 = vperm.slane %v2689_v46, 4  ;;  %3507 = vst [vmem:[#allocation46_spill] sm:$0xff] %v3003_v6 }
  0xfd   : > { %999 = vmatpush.msra.mxu0 %v2569_v19  ;;  %1022 = vmatpush.msra.mxu1 %v2571_v44  ;;  %v3475_v19 = vld [vmem:[#allocation23_spill] sm:$0xff]  ;;  %v897_v44 = vmul.f32 %v2726_v62, %v2726_v62  ;;  %v2995_v62 = vld [vmem:[#allocation10 + $0x30] sm:$0xff] }
  0xfe   : > { %953 = vmatpush.msrb.mxu2 %v3472_v63  ;;  %976 = vmatpush.msrb.mxu3 %v3473_v23  ;;  %v2859_v63 = vld [vmem:[#allocation10 + $0x248] sm:$0xff]  ;;  %v2867_v23 = vld [vmem:[#allocation10 + $0x210] sm:$0xff] }
  0xff   : > { %1000 = vmatpush.msra.mxu0 %v2581_v14  ;;  %1023 = vmatpush.msra.mxu1 %v2583_v52  ;;  %v499_v14 = vperm.slane %v2689_v46, 5  ;;  %v3490_v46 = vld [vmem:[#allocation34_spill] sm:$0xff] }
 0x100   : > { %954 = vmatpush.msrb.mxu2 %v3474_v4  ;;  %977 = vmatpush.msrb.mxu3 %v3475_v19  ;;  %v2871_v4 = vld [vmem:[#allocation10 + $0x218] sm:$0xff]  ;;  %v2879_v19 = vld [vmem:[#allocation10 + $0x1e0] sm:$0xff] }
 0x101   : > { %1001 = vmatpush.msra.mxu0 %v2593_v10  ;;  %1024 = vmatpush.msra.mxu1 %v2595_v37  ;;  %v3477_v10 = vld [vmem:[#allocation25_spill] sm:$0xff]  ;;  %v896_v37 = vmul.f32 %v2712_v54, %v2712_v54 }
 0x102   : > { %918 = vmatmul.f32.vlgmr.msrb.gmra.mxu0 %v890_v2  ;;  %941 = vmatmul.f32.vlgmr.msrb.gmra.mxu1 %v891_v3  ;;  %v2863_v2 = vld [vmem:[#allocation10 + $0x250] sm:$0xff]  ;;  %v2865_v3 = vld [vmem:[#allocation10 + $0x258] sm:$0xff] }
 0x103   : > { %1002 = vmatpush.msra.mxu0 %v2641_v16  ;;  %1025 = vmatpush.msra.mxu1 %v2643_v17  ;;  %v3483_v17 = vld [vmem:[#allocation29_spill] sm:$0xff] }
 0x104   : > { %955 = vmatpush.msrb.mxu2 %v3476_v29  ;;  %978 = vmatpush.msrb.mxu3 %v3477_v10  ;;  %v2881_v29 = vld [vmem:[#allocation10 + $0x1e8] sm:$0xff]  ;;  %v2883_v10 = vld [vmem:[#allocation10 + $0x1f0] sm:$0xff]  ;;  %v2999_v54 = vld [vmem:[#allocation10 + $0x38] sm:$0xff] }
 0x105   : > { %1003 = vmatpush.msra.mxu0 %v2647_v20  ;;  %1026 = vmatpush.msra.mxu1 %v2649_v22  ;;  %v3484_v20 = vld [vmem:[#allocation30_spill] sm:$0xff] }
 0x106   : > { %956 = vmatpush.msrb.mxu2 %v3478_v32  ;;  %979 = vmatpush.msrb.mxu3 %v3479_v48  ;;  %v2887_v32 = vld [vmem:[#allocation10 + $0x1f8] sm:$0xff]  ;;  %v2911_v48 = vld [vmem:[#allocation10 + $0x190] sm:$0xff] }
 0x107   : > { %v615_v33 = vpop.f32.mrf.mxu0  ;;  %v638_v36 = vpop.f32.mrf.mxu1  ;;  %1004 = vmatpush.msra.mxu0 %v2653_v24  ;;  %1027 = vmatpush.msra.mxu1 %v2655_v25  ;;  %3493 = vst [vmem:[#allocation24_spill] sm:$0xff] %v2911_v48 }
 0x108   : > { %v616_v40 = vadd.f32 %v615_v33, %v498_v5  ;;  %v639_v41 = vadd.f32 %v638_v36, %v499_v14  ;;  %957 = vmatpush.msrb.mxu2 %v3480_v49  ;;  %980 = vmatpush.msrb.mxu3 %v3483_v17  ;;  %v2889_v33 = vld [vmem:[#allocation10 + $0x1b0] sm:$0xff]  ;;  %v2891_v36 = vld [vmem:[#allocation10 + $0x1b8] sm:$0xff] }
 0x109   : > { %1005 = vmatpush.msra.mxu0 %v2659_v26  ;;  %1028 = vmatpush.msra.mxu1 %v2661_v27  ;;  %v2913_v49 = vld [vmem:[#allocation10 + $0x198] sm:$0xff]  ;;  %v2917_v17 = vld [vmem:[#allocation10 + $0x150] sm:$0xff] }
 0x10a   : > { %v2772_v52 = vmax.f32 %v616_v40, 0.0  ;;  %v2774_v16 = vmax.f32 %v639_v41, 0.0  ;;  %921 = vmatmul.f32.gmra.mxu0 %v896_v37  ;;  %944 = vmatmul.f32.gmra.mxu1 %v897_v44  ;;  %v2899_v37 = vld [vmem:[#allocation10 + $0x1c0] sm:$0xff]  ;;  %v2901_v40 = vld [vmem:[#allocation10 + $0x1c8] sm:$0xff]  ;;  %3494 = vst [vmem:[#allocation25_spill] sm:$0xff] %v2913_v49 }
 0x10b   : > { %1006 = vmatpush.msra.mxu0 %v2665_v30  ;;  %1029 = vmatpush.msra.mxu1 %v2667_v31  ;;  %v3485_v30 = vld [vmem:[#allocation31_spill] sm:$0xff]  ;;  %v3486_v31 = vld [vmem:[#allocation32_spill] sm:$0xff] }
 0x10c   : > { %3481 = vst [vmem:[#allocation20_spill] sm:$0xff] %v2772_v52  ;;  %860 = vmatmul.f32.vlgmr.msra.gmra.mxu2 %v2772_v52  ;;  %883 = vmatmul.f32.vlgmr.msra.gmra.mxu3 %v2774_v16  ;;  %v894_v25 = vmul.f32 %v2772_v52, %v2772_v52  ;;  %v2905_v41 = vld [vmem:[#allocation10 + $0x180] sm:$0xff]  ;;  %v2907_v44 = vld [vmem:[#allocation10 + $0x188] sm:$0xff]  ;;  %v2993_v52 = vld [vmem:[#allocation10 + $0x78] sm:$0xff] }
 0x10d   : > { %3482 = vst [vmem:[#allocation21_spill] sm:$0xff] %v2774_v16  ;;  %1007 = vmatpush.msra.mxu0 %v2671_v34  ;;  %1030 = vmatpush.msra.mxu1 %v2673_v35  ;;  %v895_v34 = vmul.f32 %v2774_v16, %v2774_v16  ;;  %v2991_v16 = vld [vmem:[#allocation10 + $0x70] sm:$0xff] }
 0x10e   : > { %958 = vmatpush.msrb.mxu2 %v3484_v20  ;;  %981 = vmatpush.msrb.mxu3 %v3485_v30  ;;  %v2919_v20 = vld [vmem:[#allocation10 + $0x158] sm:$0xff]  ;;  %3506 = vst [vmem:[#allocation45_spill] sm:$0xff] %v2993_v52 }
 0x10f   : > { %v618_v22 = vpop.f32.mrf.mxu0  ;;  %v641_v24 = vpop.f32.mrf.mxu1  ;;  %1008 = vmatpush.msra.mxu0 %v2677_v38  ;;  %1031 = vmatpush.msra.mxu1 %v2679_v39  ;;  %v3489_v39 = vld [vmem:[#allocation33_spill] sm:$0xff] }
 0x110   : > { %v619_v26 = vadd.f32 %v618_v22, %v498_v5  ;;  %v642_v27 = vadd.f32 %v641_v24, %v499_v14  ;;  %959 = vmatpush.msrb.mxu2 %v3486_v31  ;;  %982 = vmatpush.msrb.mxu3 %v3489_v39  ;;  %v2873_v5 = vld [vmem:[#allocation10 + $0x220] sm:$0xff]  ;;  %v2875_v14 = vld [vmem:[#allocation10 + $0x228] sm:$0xff]  ;;  %v2937_v30 = vld [vmem:[#allocation10 + $0x138] sm:$0xff] }
 0x111   : > { %1009 = vmatpush.msra.mxu0 %v2683_v42  ;;  %1032 = vmatpush.msra.mxu1 %v2685_v43  ;;  %v2923_v22 = vld [vmem:[#allocation10 + $0x160] sm:$0xff]  ;;  %v2925_v24 = vld [vmem:[#allocation10 + $0x168] sm:$0xff]  ;;  %3498 = vst [vmem:[#allocation29_spill] sm:$0xff] %v2937_v30  ;;  %v2939_v31 = vld [vmem:[#allocation10 + $0xf0] sm:$0xff] }
 0x112   : > { %v2794_v35 = vmax.f32 %v619_v26, 0.0  ;;  %v2796_v38 = vmax.f32 %v642_v27, 0.0  ;;  %1010 = vmatmul.f32.vlgmr.msra.gmra.mxu0 %v894_v25  ;;  %1033 = vmatmul.f32.vlgmr.msra.gmra.mxu1 %v895_v34  ;;  %3495 = vst [vmem:[#allocation26_spill] sm:$0xff] %v2923_v22  ;;  %v2929_v25 = vld [vmem:[#allocation10 + $0x120] sm:$0xff]  ;;  %v2931_v26 = vld [vmem:[#allocation10 + $0x128] sm:$0xff]  ;;  %v2935_v27 = vld [vmem:[#allocation10 + $0x130] sm:$0xff] }
 0x113   : > { %960 = vmatpush.msrb.mxu2 %v3490_v46  ;;  %983 = vmatpush.msrb.mxu3 %v3491_v47  ;;  %3496 = vst [vmem:[#allocation27_spill] sm:$0xff] %v2925_v24  ;;  %v2943_v34 = vld [vmem:[#allocation10 + $0xf8] sm:$0xff]  ;;  %v2947_v39 = vld [vmem:[#allocation10 + $0x100] sm:$0xff]  ;;  %v2949_v46 = vld [vmem:[#allocation10 + $0x108] sm:$0xff] }
 0x114   : > { %3487 = vst [vmem:[#allocation22_spill] sm:$0xff] %v2794_v35  ;;  %863 = vmatmul.f32.gmra.mxu2 %v2794_v35  ;;  %886 = vmatmul.f32.gmra.mxu3 %v2796_v38  ;;  %v900_v42 = vmul.f32 %v2794_v35, %v2794_v35  ;;  %v901_v43 = vmul.f32 %v2796_v38, %v2796_v38  ;;  %v2953_v47 = vld [vmem:[#allocation10 + $0xc0] sm:$0xff]  ;;  %v2977_v35 = vld [vmem:[#allocation10 + $0xa8] sm:$0xff] }
 0x115   : > { %3488 = vst [vmem:[#allocation23_spill] sm:$0xff] %v2796_v38  ;;  %961 = vmatpush.msrb.mxu2 %v2573_v45  ;;  %984 = vmatpush.msrb.mxu3 %v2575_v18  ;;  %v893_v45 = vmul.f32 %v2704_v8, %v2704_v8  ;;  %v3492_v18 = vld [vmem:[#allocation36_spill] sm:$0xff]  ;;  %v2975_v38 = vld [vmem:[#allocation10 + $0xa0] sm:$0xff] }
 0x116   : > { %1210 = vmatpush.msrb.mxu0 %v2825_v60  ;;  %1233 = vmatpush.msrb.mxu1 %v2829_v12  ;;  %3497 = vst [vmem:[#allocation28_spill] sm:$0xff] %v2935_v27  ;;  %v2985_v8 = vld [vmem:[#allocation10 + $0x60] sm:$0xff] }
 0x117   : > { %962 = vmatpush.msrb.mxu2 %v2585_v53  ;;  %985 = vmatpush.msrb.mxu3 %v2587_v13  ;;  %v898_v13 = vmul.f32 %v2722_v21, %v2722_v21  ;;  %v2821_v53 = vld [vmem:[#allocation10 + $0x2d0] sm:$0xff]  ;;  %3499 = vst [vmem:[#allocation30_spill] sm:$0xff] %v2947_v39 }
 0x118   : > { %1211 = vmatpush.msrb.mxu0 %v2837_v56  ;;  %1234 = vmatpush.msrb.mxu1 %v2839_v61  ;;  %3500 = vst [vmem:[#allocation31_spill] sm:$0xff] %v2949_v46 }
 0x119   : > { %963 = vmatpush.msrb.mxu2 %v2597_v28  ;;  %986 = vmatpush.msrb.mxu3 %v3492_v18  ;;  %v899_v28 = vmul.f32 %v2724_v59, %v2724_v59  ;;  %v2967_v18 = vld [vmem:[#allocation10 + $0x90] sm:$0xff]  ;;  %3503 = vst [vmem:[#allocation34_spill] sm:$0xff] %v2975_v38 }
 0x11a   : > { %1013 = vmatmul.f32.gmra.mxu0 %v900_v42  ;;  %1036 = vmatmul.f32.gmra.mxu1 %v901_v43  ;;  %v2955_v42 = vld [vmem:[#allocation10 + $0xc8] sm:$0xff]  ;;  %3504 = vst [vmem:[#allocation35_spill] sm:$0xff] %v2977_v35 }
 0x11b   : > { %1164 = vmatpush.msra.mxu2 %v2821_v53  ;;  %1187 = vmatpush.msra.mxu3 %v2823_v57  ;;  %3505 = vst [vmem:[#allocation36_spill] sm:$0xff] %v2991_v16 }
 0x11c   : > { %964 = vmatmul.f32.vlgmr.msrb.gmra.mxu2 %v892_v50  ;;  %987 = vmatmul.f32.vlgmr.msrb.gmra.mxu3 %v893_v45  ;;  %v2961_v50 = vld [vmem:[#allocation10 + $0xd0] sm:$0xff]  ;;  %v2963_v45 = vld [vmem:[#allocation10 + $0xd8] sm:$0xff] }
 0x11d   : > { %1165 = vmatpush.msra.mxu2 %v2831_v9  ;;  %1188 = vmatpush.msra.mxu3 %v2833_v51  ;;  %3501 = vst [vmem:[#allocation32_spill] sm:$0xff] %v2961_v50 }
 0x11e   : > { %1212 = vmatpush.msrb.mxu0 %v2847_v7  ;;  %1235 = vmatpush.msrb.mxu1 %v2849_v58  ;;  %3502 = vst [vmem:[#allocation33_spill] sm:$0xff] %v2963_v45 }
 0x11f   : > { %1166 = vmatpush.msra.mxu2 %v2841_v0  ;;  %1189 = vmatpush.msra.mxu3 %v2845_v55 }
 0x120   : > { %1213 = vmatpush.msrb.mxu0 %v2863_v2  ;;  %1236 = vmatpush.msrb.mxu1 %v2865_v3 }
 0x121   : > { %1167 = vmatpush.msra.mxu2 %v2857_v11  ;;  %1190 = vmatpush.msra.mxu3 %v2859_v63 }
 0x122   : > { %1214 = vmatpush.msrb.mxu0 %v2873_v5  ;;  %1237 = vmatpush.msrb.mxu1 %v2875_v14 }
 0x123   : > { %1168 = vmatpush.msra.mxu2 %v2867_v23  ;;  %1191 = vmatpush.msra.mxu3 %v2871_v4 }
 0x124   : > { %967 = vmatmul.f32.gmra.mxu2 %v898_v13  ;;  %990 = vmatmul.f32.gmra.mxu3 %v899_v28  ;;  %v2969_v13 = vld [vmem:[#allocation10 + $0x98] sm:$0xff] }
 0x125   : > { %1169 = vmatpush.msra.mxu2 %v2879_v19  ;;  %1192 = vmatpush.msra.mxu3 %v2881_v29 }
 0x126   : > { %1215 = vmatpush.msrb.mxu0 %v2883_v10  ;;  %1238 = vmatpush.msrb.mxu1 %v2887_v32 }
 0x127   : > { %1170 = vmatpush.msra.mxu2 %v2889_v33  ;;  %1193 = vmatpush.msra.mxu3 %v2891_v36 }
 0x128   : > { %1216 = vmatpush.msrb.mxu0 %v2899_v37  ;;  %1239 = vmatpush.msrb.mxu1 %v2901_v40 }
 0x129   : > { %1171 = vmatpush.msra.mxu2 %v2905_v41  ;;  %1194 = vmatpush.msra.mxu3 %v2907_v44 }
 0x12a   : > { %1217 = vmatpush.msrb.mxu0 %v2911_v48  ;;  %1240 = vmatpush.msrb.mxu1 %v2913_v49 }
 0x12b   : > { %1172 = vmatpush.msra.mxu2 %v2917_v17  ;;  %1195 = vmatpush.msra.mxu3 %v2919_v20 }
 0x12c   : > { %1218 = vmatpush.msrb.mxu0 %v2923_v22  ;;  %1241 = vmatpush.msrb.mxu1 %v2925_v24  ;;  %v3059_v24 = vld [vmem:[#allocation10 + $0x230] sm:$0xff] }
 0x12d   : > { %1173 = vmatpush.msra.mxu2 %v2929_v25  ;;  %1196 = vmatpush.msra.mxu3 %v2931_v26 }
 0x12e   : > { %1219 = vmatpush.msrb.mxu0 %v2935_v27  ;;  %1242 = vmatpush.msrb.mxu1 %v2937_v30 }
 0x12f   : > { %1174 = vmatpush.msra.mxu2 %v2939_v31  ;;  %1197 = vmatpush.msra.mxu3 %v2943_v34 }
 0x130   : > { %1220 = vmatpush.msrb.mxu0 %v2947_v39  ;;  %1243 = vmatpush.msrb.mxu1 %v2949_v46  ;;  %v3031_v46 = vld [vmem:[#allocation10 + $0x2c8] sm:$0xff] }
 0x131   : > { %1175 = vmatpush.msra.mxu2 %v2953_v47  ;;  %1198 = vmatpush.msra.mxu3 %v2955_v42 }
 0x132   : > { %1221 = vmatpush.msrb.mxu0 %v2961_v50  ;;  %1244 = vmatpush.msrb.mxu1 %v2963_v45  ;;  %v3019_v45 = vld [vmem:[#allocation10 + $0x2f0] sm:$0xff]  ;;  %v3029_v50 = vld [vmem:[#allocation10 + $0x2c0] sm:$0xff] }
 0x133   : > { %1176 = vmatpush.msra.mxu2 %v2967_v18  ;;  %1199 = vmatpush.msra.mxu3 %v2969_v13 }
 0x134   : > { %1222 = vmatpush.msrb.mxu0 %v2975_v38  ;;  %1245 = vmatpush.msrb.mxu1 %v2977_v35  ;;  %v3009_v35 = vld [vmem:[#allocation10] sm:$0xff]  ;;  %v3011_v38 = vld [vmem:[#allocation10 + $0x8] sm:$0xff] }
 0x135   : > { %1177 = vmatpush.msra.mxu2 %v2985_v8  ;;  %1200 = vmatpush.msra.mxu3 %v2987_v15 }
 0x136   : > { %1223 = vmatpush.msrb.mxu0 %v2991_v16  ;;  %1246 = vmatpush.msrb.mxu1 %v2993_v52  ;;  %v3015_v52 = vld [vmem:[#allocation10 + $0x10] sm:$0xff]  ;;  %v3017_v16 = vld [vmem:[#allocation10 + $0x18] sm:$0xff] }
 0x137   : > { %1178 = vmatpush.msra.mxu2 %v2995_v62  ;;  %1201 = vmatpush.msra.mxu3 %v2999_v54  ;;  %3509 = vst [vmem:[#allocation48_spill] sm:$0xff] %v3015_v52 }
 0x138   : > { %1224 = vmatpush.msrb.mxu0 %v3003_v6  ;;  %1247 = vmatpush.msrb.mxu1 %v3005_v1  ;;  %3510 = vst [vmem:[#allocation49_spill] sm:$0xff] %v3017_v16  ;;  %v3023_v6 = vld [vmem:[#allocation10 + $0x2f8] sm:$0xff] }
 0x139   : > { %1179 = vmatpush.msra.mxu2 %v3009_v35  ;;  %1202 = vmatpush.msra.mxu3 %v3011_v38 }
 0x13a   : > { %1225 = vmatpush.msrb.mxu0 %v3015_v52  ;;  %1248 = vmatpush.msrb.mxu1 %v3017_v16  ;;  %v3039_v16 = vld [vmem:[#allocation10 + $0x290] sm:$0xff]  ;;  %v3041_v52 = vld [vmem:[#allocation10 + $0x298] sm:$0xff] }
 0x13b   : > { %1256 = vmatpush.msrb.mxu2 %v3019_v45  ;;  %1279 = vmatpush.msrb.mxu3 %v3023_v6 }
 0x13c   : > { %1304 = vmatpush.msra.mxu0 %v2821_v53  ;;  %1327 = vmatpush.msra.mxu1 %v2823_v57  ;;  %v3051_v53 = vld [vmem:[#allocation10 + $0x260] sm:$0xff]  ;;  %v3053_v57 = vld [vmem:[#allocation10 + $0x268] sm:$0xff] }
 0x13d   : > { %1257 = vmatpush.msrb.mxu2 %v3029_v50  ;;  %1280 = vmatpush.msrb.mxu3 %v3031_v46 }
 0x13e   : > { %1305 = vmatpush.msra.mxu0 %v2831_v9  ;;  %1328 = vmatpush.msra.mxu1 %v2833_v51  ;;  %v3061_v9 = vld [vmem:[#allocation10 + $0x238] sm:$0xff]  ;;  %v3067_v51 = vld [vmem:[#allocation10 + $0x200] sm:$0xff] }
 0x13f   : > { %1258 = vmatpush.msrb.mxu2 %v3039_v16  ;;  %1281 = vmatpush.msrb.mxu3 %v3041_v52 }
 0x140   : > { %1306 = vmatpush.msra.mxu0 %v2841_v0  ;;  %1329 = vmatpush.msra.mxu1 %v2845_v55  ;;  %v3069_v0 = vld [vmem:[#allocation10 + $0x208] sm:$0xff] }
 0x141   : > { %1259 = vmatpush.msrb.mxu2 %v3051_v53  ;;  %1282 = vmatpush.msrb.mxu3 %v3053_v57 }
 0x142   : > { %1307 = vmatpush.msra.mxu0 %v2857_v11  ;;  %1330 = vmatpush.msra.mxu1 %v2859_v63  ;;  %v3077_v11 = vld [vmem:[#allocation10 + $0x1d0] sm:$0xff]  ;;  %v3079_v63 = vld [vmem:[#allocation10 + $0x1d8] sm:$0xff] }
 0x143   : > { %1260 = vmatpush.msrb.mxu2 %v3059_v24  ;;  %1283 = vmatpush.msrb.mxu3 %v3061_v9  ;;  %3511 = vst [vmem:[#allocation50_spill] sm:$0xff] %v3079_v63 }
 0x144   : > { %1308 = vmatpush.msra.mxu0 %v2867_v23  ;;  %1331 = vmatpush.msra.mxu1 %v2871_v4  ;;  %v3085_v23 = vld [vmem:[#allocation10 + $0x1a0] sm:$0xff]  ;;  %v3087_v4 = vld [vmem:[#allocation10 + $0x1a8] sm:$0xff] }
 0x145   : > { %1261 = vmatpush.msrb.mxu2 %v3067_v51  ;;  %1284 = vmatpush.msrb.mxu3 %v3069_v0 }
 0x146   : > { %1309 = vmatpush.msra.mxu0 %v2879_v19  ;;  %1332 = vmatpush.msra.mxu1 %v2881_v29  ;;  %v3095_v19 = vld [vmem:[#allocation10 + $0x170] sm:$0xff]  ;;  %v3097_v29 = vld [vmem:[#allocation10 + $0x178] sm:$0xff] }
 0x147   : > { %1262 = vmatpush.msrb.mxu2 %v3077_v11  ;;  %1285 = vmatpush.msrb.mxu3 %v3079_v63  ;;  %3512 = vst [vmem:[#allocation51_spill] sm:$0xff] %v3097_v29  ;;  %v3103_v63 = vld [vmem:[#allocation10 + $0x140] sm:$0xff] }
 0x148   : > { %1310 = vmatpush.msra.mxu0 %v2889_v33  ;;  %1333 = vmatpush.msra.mxu1 %v2891_v36  ;;  %v3105_v33 = vld [vmem:[#allocation10 + $0x148] sm:$0xff] }
 0x149   : > { %1263 = vmatpush.msrb.mxu2 %v3085_v23  ;;  %1286 = vmatpush.msrb.mxu3 %v3087_v4  ;;  %3513 = vst [vmem:[#allocation52_spill] sm:$0xff] %v3105_v33 }
 0x14a   : > { %1311 = vmatpush.msra.mxu0 %v2905_v41  ;;  %1334 = vmatpush.msra.mxu1 %v2907_v44  ;;  %v3113_v41 = vld [vmem:[#allocation10 + $0x110] sm:$0xff]  ;;  %v3115_v44 = vld [vmem:[#allocation10 + $0x118] sm:$0xff] }
 0x14b   : > { %1264 = vmatpush.msrb.mxu2 %v3095_v19  ;;  %1287 = vmatpush.msrb.mxu3 %v3097_v29  ;;  %3514 = vst [vmem:[#allocation53_spill] sm:$0xff] %v3115_v44 }
 0x14c   : > { %1312 = vmatpush.msra.mxu0 %v2917_v17  ;;  %1335 = vmatpush.msra.mxu1 %v2919_v20  ;;  %v3121_v17 = vld [vmem:[#allocation10 + $0xe0] sm:$0xff] }
 0x14d   : > { %1265 = vmatpush.msrb.mxu2 %v3103_v63  ;;  %1288 = vmatpush.msrb.mxu3 %v3105_v33 }
 0x14e   : > { %1313 = vmatpush.msra.mxu0 %v2929_v25  ;;  %1336 = vmatpush.msra.mxu1 %v2931_v26  ;;  %v3130_v25 = vld [vmem:[#allocation10 + $0xb0] sm:$0xff]  ;;  %v3132_v26 = vld [vmem:[#allocation10 + $0xb8] sm:$0xff] }
 0x14f   : > { %1266 = vmatpush.msrb.mxu2 %v3113_v41  ;;  %1289 = vmatpush.msrb.mxu3 %v3115_v44 }
 0x150   : > { %1314 = vmatpush.msra.mxu0 %v2939_v31  ;;  %1337 = vmatpush.msra.mxu1 %v2943_v34  ;;  %v3138_v31 = vld [vmem:[#allocation10 + $0x80] sm:$0xff]  ;;  %v3140_v34 = vld [vmem:[#allocation10 + $0x88] sm:$0xff] }
 0x151   : > { %1267 = vmatpush.msrb.mxu2 %v3121_v17  ;;  %3515 = vst [vmem:[#allocation54_spill] sm:$0xff] %v3140_v34 }
 0x152   : > { %1315 = vmatpush.msra.mxu0 %v2953_v47  ;;  %1338 = vmatpush.msra.mxu1 %v2955_v42  ;;  %v3149_v47 = vld [vmem:[#allocation10 + $0x50] sm:$0xff]  ;;  %v3151_v42 = vld [vmem:[#allocation10 + $0x58] sm:$0xff] }
 0x153   : > { %1268 = vmatpush.msrb.mxu2 %v3130_v25  ;;  %3516 = vst [vmem:[#allocation55_spill] sm:$0xff] %v3149_v47 }
 0x154   : > { %1316 = vmatpush.msra.mxu0 %v2967_v18  ;;  %1339 = vmatpush.msra.mxu1 %v2969_v13  ;;  %3517 = vst [vmem:[#allocation56_spill] sm:$0xff] %v3151_v42 }
 0x155   : > { %1269 = vmatpush.msrb.mxu2 %v3138_v31 }
 0x156   : > { %1317 = vmatpush.msra.mxu0 %v2985_v8  ;;  %1340 = vmatpush.msra.mxu1 %v2987_v15 }
 0x157   : > { %1270 = vmatpush.msrb.mxu2 %v3149_v47 }
 0x158   : > { %1318 = vmatpush.msra.mxu0 %v2995_v62  ;;  %1341 = vmatpush.msra.mxu1 %v2999_v54 }
 0x15a   : > { %1319 = vmatpush.msra.mxu0 %v3009_v35  ;;  %1342 = vmatpush.msra.mxu1 %v3011_v38 }
 0x16f   : > { %v2957_v43 = vpop.f32.mrf.mxu0  ;;  %v2971_v28 = vpop.f32.mrf.mxu1 }
 0x171   : > { %v2979_v59 = vpop.f32.mrf.mxu2  ;;  %v2981_v21 = vpop.f32.mrf.mxu3 }
 0x172   : > { %v793_v36 = vadd.f32 %v2981_v21, %v2979_v59  ;;  %v3123_v21 = vld [vmem:[#allocation10 + $0xe8] sm:$0xff] }
 0x173   : > { %1290 = vmatpush.msrb.mxu3 %v3123_v21 }
 0x174   : > { %v816_v33 = vadd.f32 %v2957_v43, %v793_v36 }
 0x175   : > { %1291 = vmatpush.msrb.mxu3 %v3132_v26 }
 0x176   : > { %v839_v36 = vadd.f32 %v2971_v28, %v816_v33 }
 0x177   : > { %v3025_v1 = vpop.f32.mrf.mxu0  ;;  %v3035_v39 = vpop.f32.mrf.mxu1  ;;  %1292 = vmatpush.msrb.mxu3 %v3140_v34 }
 0x179   : > { %1293 = vmatpush.msrb.mxu3 %v3151_v42 }
 0x17b   : > { %v3043_v30 = vpop.f32.mrf.mxu2  ;;  %v3045_v27 = vpop.f32.mrf.mxu3 }
 0x17c   : > { %v796_v43 = vadd.f32 %v3045_v27, %v3043_v30  ;;  %v3158_v27 = vld [vmem:[#allocation10 + $0x20] sm:$0xff]  ;;  %v3160_v30 = vld [vmem:[#allocation10 + $0x28] sm:$0xff] }
 0x17d   : > { %3518 = vst [vmem:[#allocation57_spill] sm:$0xff] %v3158_v27  ;;  %1271 = vmatpush.msrb.mxu2 %v3158_v27  ;;  %1294 = vmatpush.msrb.mxu3 %v3160_v30 }
 0x17e   : > { %3519 = vst [vmem:[#allocation58_spill] sm:$0xff] %v3160_v30  ;;  %v819_v8 = vadd.f32 %v3025_v1, %v796_v43 }
 0x17f   : > { %v3073_v55 = vpop.f32.mrf.mxu0  ;;  %v942_v22 = vpop.f32.mrf.mxu1 }
 0x180   : > { %v943_v18 = vadd.f32 %v942_v22, %v3073_v55  ;;  %v842_v62 = vadd.f32 %v3035_v39, %v819_v8 }
 0x187   : > { %v922_v29 = vpop.f32.mrf.mxu0  ;;  %v945_v44 = vpop.f32.mrf.mxu1 }
 0x188   : > { %v946_v42 = vadd.f32 %v945_v44, %v922_v29 }
 0x18f   : > { %v861_v49 = vpop.f32.mrf.mxu2  ;;  %v3089_v48 = vpop.f32.mrf.mxu3 }
 0x190   : > { %v862_v13 = vadd.f32 %v861_v49, %v839_v36  ;;  %v1011_v49 = vpop.f32.mrf.mxu0  ;;  %v1034_v36 = vpop.f32.mrf.mxu1 }
 0x192   : > { %v3170_v22 = vadd.f32 %v3089_v48, %v862_v13 }
 0x194   : > { %v1040_v1 = vmul.f32 %v3170_v22, %v3170_v22 }
 0x197   : > { %v864_v59 = vpop.f32.mrf.mxu2  ;;  %v887_v20 = vpop.f32.mrf.mxu3 }
 0x198   : > { %v865_v43 = vadd.f32 %v864_v59, %v842_v62  ;;  %v1014_v13 = vpop.f32.mrf.mxu0  ;;  %v1037_v34 = vpop.f32.mrf.mxu1 }
 0x19a   : > { %v3175_v47 = vadd.f32 %v887_v20, %v865_v43 }
 0x19c   : > { %v1041_v39 = vmul.f32 %v3175_v47, %v3175_v47 }
 0x19f   : > { %v965_v28 = vpop.f32.mrf.mxu2  ;;  %v988_v33 = vpop.f32.mrf.mxu3 }
 0x1a0   : > { %v966_v15 = vadd.f32 %v965_v28, %v943_v18 }
 0x1a2   : > { %v989_v55 = vadd.f32 %v988_v33, %v966_v15 }
 0x1a4   : > { %v1012_v54 = vadd.f32 %v1011_v49, %v989_v55 }
 0x1a6   : > { %v1035_v18 = vadd.f32 %v1034_v36, %v1012_v54 }
 0x1a7   : > { %v968_v28 = vpop.f32.mrf.mxu2  ;;  %v991_v35 = vpop.f32.mrf.mxu3 }
 0x1a8   : > { %v1042_v30 = vsub.f32 %v1035_v18, %v1040_v1  ;;  %v969_v27 = vadd.f32 %v968_v28, %v946_v42  ;;  %v3533_v28 = vld [vmem:[#allocation33_spill] sm:$0xff] }
 0x1aa   : > { %v1044_v38 = vmax.f32 %v1042_v30, 0.0  ;;  %v992_v48 = vadd.f32 %v991_v35, %v969_v27 }
 0x1ac   : > { %v1046_v33 = vadd.f32 1e-05, %v1044_v38  ;;  %v1015_v15 = vadd.f32 %v1014_v13, %v992_v48  ;;  %v3534_v38 = vld [vmem:[#allocation34_spill] sm:$0xff]  ;;  %v3535_v48 = vld [vmem:[#allocation35_spill] sm:$0xff]  ;;  %v3536_v13 = vld [vmem:[#allocation36_spill] sm:$0xff] }
 0x1ae   : > { %1850 = vrsqrt.f32 %v1046_v33  ;;  %v1038_v29 = vadd.f32 %v1037_v34, %v1015_v15  ;;  %vm1054_vm1 = vweird.f32 %v1046_v33  ;;  %v3538_v15 = vld [vmem:[#allocation54_spill] sm:$0xff] }
 0x1b0   : > { %v1043_v44 = vsub.f32 %v1038_v29, %v1041_v39  ;;  %v3540_v39 = vld [vmem:[#allocation47_spill] sm:$0xff] }
 0x1b1   : > { %v3541_v29 = vld [vmem:[#allocation55_spill] sm:$0xff] }
 0x1b2   : > { %v1045_v59 = vmax.f32 %v1043_v44, 0.0  ;;  %v3542_v44 = vld [vmem:[#allocation56_spill] sm:$0xff] }
 0x1b4   : > { %v1851_v8 = vpop.eup %1850  ;;  %v1047_v49 = vadd.f32 1e-05, %v1045_v59  ;;  %v3543_v59 = vld [vmem:[#allocation48_spill] sm:$0xff] }
 0x1b5   : > { %v1049_v55 = vmul.f32 %v1851_v8, %v1046_v33  ;;  %vm1055_vm0 = vweird.f32 %v1851_v8  ;;  %v3537_v33 = vld [vmem:[#allocation45_spill] sm:$0xff] }
 0x1b6   : > { %1852 = vrsqrt.f32 %v1047_v49  ;;  %vm1056_vm2 = vmor %vm1054_vm1, %vm1055_vm0  ;;  %vm1064_vm4 = vweird.f32 %v1047_v49 }
 0x1b7   : > { %v1050_v42 = vmul.f32 %v1851_v8, %v1049_v55  ;;  %v3546_v55 = vld [vmem:[#allocation58_spill] sm:$0xff] }
 0x1b9   : > { %v1051_v20 = vmul.f32 0.5, %v1050_v42 }
 0x1bb   : > { %v1052_v36 = vsub.f32 1.5, %v1051_v20 }
 0x1bc   : > { %v1853_v27 = vpop.eup %1852 }
 0x1bd   : > { %v1059_v30 = vmul.f32 %v1853_v27, %v1047_v49  ;;  %v1053_v62 = vmul.f32 %v1851_v8, %v1052_v36  ;;  %vm1065_vm3 = vweird.f32 %v1853_v27  ;;  %v3545_v49 = vld [vmem:[#allocation57_spill] sm:$0xff] }
 0x1be   : > { %vm1066_vm5 = vmor %vm1064_vm4, %vm1065_vm3 }
 0x1bf   : > { %v1060_v54 = vmul.f32 %v1853_v27, %v1059_v30  ;;  %v1057_v1 = vsel %vm1056_vm2, %v1851_v8, %v1053_v62  ;;  %v3544_v8 = vld [vmem:[#allocation49_spill] sm:$0xff] }
 0x1c0   : > { %1180 = vmatmul.f32.vlgmr.msra.gmra.mxu2 %v1057_v1  ;;  %1203 = vmatmul.f32.vlgmr.msra.gmra.mxu3 %v1057_v1  ;;  %v3549_v62 = vld [vmem:[#allocation41_spill] sm:$0xff] }
 0x1c1   : > { %v1061_v34 = vmul.f32 0.5, %v1060_v54  ;;  %1226 = vmatmul.f32.vlgmr.msrb.gmra.mxu0 %v1057_v1  ;;  %1249 = vmatmul.f32.vlgmr.msrb.gmra.mxu1 %v1057_v1 }
 0x1c2   : > { %1350 = vmatpush.msra.mxu2 %v2825_v60  ;;  %1373 = vmatpush.msra.mxu3 %v2829_v12  ;;  %v3520_v12 = vld [vmem:[#allocation50_spill] sm:$0xff] }
 0x1c3   : > { %v1062_v43 = vsub.f32 1.5, %v1061_v34  ;;  %1396 = vmatpush.msrb.mxu0 %v3019_v45  ;;  %1419 = vmatpush.msrb.mxu1 %v3023_v6 }
 0x1c4   : > { %1351 = vmatpush.msra.mxu2 %v2837_v56  ;;  %1374 = vmatpush.msra.mxu3 %v2839_v61  ;;  %v3521_v56 = vld [vmem:[#allocation24_spill] sm:$0xff]  ;;  %v3522_v61 = vld [vmem:[#allocation25_spill] sm:$0xff] }
 0x1c5   : > { %1397 = vmatpush.msrb.mxu0 %v3029_v50  ;;  %1420 = vmatpush.msrb.mxu1 %v3031_v46  ;;  %v1063_v18 = vmul.f32 %v1853_v27, %v1062_v43 }
 0x1c6   : > { %1352 = vmatpush.msra.mxu2 %v2847_v7  ;;  %1375 = vmatpush.msra.mxu3 %v2849_v58  ;;  %v1302_v7 = vmul.f32 %v1057_v1, %v3170_v22  ;;  %v3523_v58 = vld [vmem:[#allocation26_spill] sm:$0xff]  ;;  %v3532_v22 = vld [vmem:[#allocation32_spill] sm:$0xff] }
 0x1c7   : > { %1398 = vmatpush.msrb.mxu0 %v3039_v16  ;;  %1421 = vmatpush.msrb.mxu1 %v3041_v52  ;;  %v1067_v60 = vsel %vm1066_vm5, %v1853_v27, %v1063_v18 }
 0x1c8   : > { %1353 = vmatpush.msra.mxu2 %v2863_v2  ;;  %1376 = vmatpush.msra.mxu3 %v2865_v3  ;;  %v3524_v2 = vld [vmem:[#allocation27_spill] sm:$0xff]  ;;  %v1303_v35 = vmul.f32 %v1067_v60, %v3175_v47  ;;  %v3539_v47 = vld [vmem:[#allocation46_spill] sm:$0xff] }
 0x1c9   : > { %1399 = vmatpush.msrb.mxu0 %v3051_v53  ;;  %1422 = vmatpush.msrb.mxu1 %v3053_v57  ;;  %v3525_v3 = vld [vmem:[#allocation51_spill] sm:$0xff] }
 0x1ca   : > { %1183 = vmatmul.f32.gmra.mxu2 %v1067_v60  ;;  %1206 = vmatmul.f32.gmra.mxu3 %v1067_v60 }
 0x1cb   : > { %1229 = vmatmul.f32.gmra.mxu0 %v1067_v60  ;;  %1252 = vmatmul.f32.gmra.mxu1 %v1067_v60 }
 0x1cc   : > { %1354 = vmatpush.msra.mxu2 %v2873_v5  ;;  %1377 = vmatpush.msra.mxu3 %v2875_v14  ;;  %v3526_v5 = vld [vmem:[#allocation28_spill] sm:$0xff]  ;;  %v3527_v14 = vld [vmem:[#allocation29_spill] sm:$0xff] }
 0x1cd   : > { %1400 = vmatpush.msrb.mxu0 %v3059_v24  ;;  %1423 = vmatpush.msrb.mxu1 %v3061_v9 }
 0x1ce   : > { %1355 = vmatpush.msra.mxu2 %v2883_v10  ;;  %1378 = vmatpush.msra.mxu3 %v2887_v32  ;;  %v3528_v10 = vld [vmem:[#allocation52_spill] sm:$0xff]  ;;  %v3529_v32 = vld [vmem:[#allocation30_spill] sm:$0xff] }
 0x1cf   : > { %1401 = vmatpush.msrb.mxu0 %v3067_v51  ;;  %1424 = vmatpush.msrb.mxu1 %v3069_v0 }
 0x1d0   : > { %1356 = vmatpush.msra.mxu2 %v2899_v37  ;;  %1379 = vmatpush.msra.mxu3 %v2901_v40  ;;  %v3530_v37 = vld [vmem:[#allocation31_spill] sm:$0xff]  ;;  %v3531_v40 = vld [vmem:[#allocation53_spill] sm:$0xff] }
 0x1d1   : > { %1402 = vmatpush.msrb.mxu0 %v3077_v11  ;;  %1425 = vmatpush.msrb.mxu1 %v3520_v12 }
 0x1d2   : > { %1357 = vmatpush.msra.mxu2 %v3521_v56  ;;  %1380 = vmatpush.msra.mxu3 %v3522_v61 }
 0x1d3   : > { %1403 = vmatpush.msrb.mxu0 %v3085_v23  ;;  %1426 = vmatpush.msrb.mxu1 %v3087_v4 }
 0x1d4   : > { %1272 = vmatmul.f32.vlgmr.msrb.gmra.mxu2 %v1057_v1  ;;  %1295 = vmatmul.f32.vlgmr.msrb.gmra.mxu3 %v1057_v1  ;;  %v3550_v1 = vld [vmem:[#allocation44_spill] sm:$0xff] }
 0x1d5   : > { %1320 = vmatmul.f32.vlgmr.msra.gmra.mxu0 %v1302_v7  ;;  %1343 = vmatmul.f32.vlgmr.msra.gmra.mxu1 %v1302_v7 }
 0x1d6   : > { %1358 = vmatpush.msra.mxu2 %v3523_v58  ;;  %1381 = vmatpush.msra.mxu3 %v3524_v2 }
 0x1d7   : > { %1404 = vmatpush.msrb.mxu0 %v3095_v19  ;;  %1427 = vmatpush.msrb.mxu1 %v3525_v3 }
 0x1d8   : > { %1359 = vmatpush.msra.mxu2 %v3526_v5  ;;  %1382 = vmatpush.msra.mxu3 %v3527_v14  ;;  %v3551_v5 = vld [vmem:[#allocation20_spill] sm:$0xff] }
 0x1d9   : > { %1405 = vmatpush.msrb.mxu0 %v3103_v63  ;;  %1428 = vmatpush.msrb.mxu1 %v3528_v10 }
 0x1da   : > { %1360 = vmatpush.msra.mxu2 %v3529_v32  ;;  %1383 = vmatpush.msra.mxu3 %v3530_v37 }
 0x1db   : > { %1406 = vmatpush.msrb.mxu0 %v3113_v41  ;;  %1429 = vmatpush.msrb.mxu1 %v3531_v40 }
 0x1dc   : > { %1361 = vmatpush.msra.mxu2 %v3532_v22  ;;  %1384 = vmatpush.msra.mxu3 %v3533_v28 }
 0x1dd   : > { %1407 = vmatpush.msrb.mxu0 %v3121_v17  ;;  %1430 = vmatpush.msrb.mxu1 %v3123_v21 }
 0x1de   : > { %1275 = vmatmul.f32.gmra.mxu2 %v1067_v60  ;;  %1298 = vmatmul.f32.gmra.mxu3 %v1067_v60 }
 0x1df   : > { %1323 = vmatmul.f32.gmra.mxu0 %v1303_v35  ;;  %1346 = vmatmul.f32.gmra.mxu1 %v1303_v35 }
 0x1e0   : > { %1362 = vmatpush.msra.mxu2 %v3534_v38  ;;  %1385 = vmatpush.msra.mxu3 %v3535_v48 }
 0x1e1   : > { %1408 = vmatpush.msrb.mxu0 %v3130_v25  ;;  %1431 = vmatpush.msrb.mxu1 %v3132_v26 }
 0x1e2   : > { %1363 = vmatpush.msra.mxu2 %v3536_v13  ;;  %1386 = vmatpush.msra.mxu3 %v3537_v33 }
 0x1e3   : > { %1409 = vmatpush.msrb.mxu0 %v3138_v31  ;;  %1432 = vmatpush.msrb.mxu1 %v3538_v15 }
 0x1e4   : > { %1364 = vmatpush.msra.mxu2 %v3539_v47  ;;  %1387 = vmatpush.msra.mxu3 %v3540_v39  ;;  %v3553_v47 = vld [vmem:[#allocation39_spill] sm:$0xff] }
 0x1e5   : > { %1410 = vmatpush.msrb.mxu0 %v3541_v29  ;;  %1433 = vmatpush.msrb.mxu1 %v3542_v44 }
 0x1e6   : > { %1365 = vmatpush.msra.mxu2 %v3543_v59  ;;  %1388 = vmatpush.msra.mxu3 %v3544_v8 }
 0x1e7   : > { %1411 = vmatpush.msrb.mxu0 %v3545_v49  ;;  %1434 = vmatpush.msrb.mxu1 %v3546_v55 }
 0x1e8   : > { %1703 = vmatpush.msrb.mxu2 %v3019_v45  ;;  %1719 = vmatpush.msrb.mxu3 %v3023_v6 }
 0x1e9   : > { %1366 = vmatmul.f32.vlgmr.msra.gmra.mxu2 %v1302_v7  ;;  %1389 = vmatmul.f32.vlgmr.msra.gmra.mxu3 %v1302_v7 }
 0x1ea   : > { %1412 = vmatmul.f32.vlgmr.msrb.gmra.mxu0 %v1302_v7  ;;  %1435 = vmatmul.f32.vlgmr.msrb.gmra.mxu1 %v1302_v7 }
 0x1eb   : > { %1704 = vmatpush.msrb.mxu2 %v3029_v50  ;;  %1720 = vmatpush.msrb.mxu3 %v3031_v46 }
 0x1ed   : > { %1705 = vmatpush.msrb.mxu2 %v3039_v16  ;;  %1721 = vmatpush.msrb.mxu3 %v3041_v52 }
 0x1ef   : > { %1706 = vmatpush.msrb.mxu2 %v3051_v53  ;;  %1722 = vmatpush.msrb.mxu3 %v3053_v57  ;;  %v3281_v57 = vld [vmem:[#allocation11] sm:$0x3f] }
 0x1f0   : > { %v1472_v37 = vperm.slane %v3281_v57, 4  ;;  %v1470_v59 = vperm.slane %v3281_v57, 2  ;;  %v1471_v8 = vperm.slane %v3281_v57, 3 }
 0x1f1   : > { %1707 = vmatpush.msrb.mxu2 %v3059_v24  ;;  %1723 = vmatpush.msrb.mxu3 %v3061_v9  ;;  %v3283_v9 = vld [vmem:[#allocation13] sm:$0x3f] }
 0x1f2   : > { %1369 = vmatmul.f32.gmra.mxu2 %v1303_v35  ;;  %1392 = vmatmul.f32.gmra.mxu3 %v1303_v35  ;;  %v1498_v38 = vperm.slane %v3283_v9, 4  ;;  %v1499_v13 = vperm.slane %v3283_v9, 5 }
 0x1f3   : > { %1708 = vmatpush.msrb.mxu2 %v3067_v51  ;;  %1724 = vmatpush.msrb.mxu3 %v3069_v0  ;;  %v3547_v51 = vld [vmem:[#allocation37_spill] sm:$0xff] }
 0x1f5   : > { %1709 = vmatpush.msrb.mxu2 %v3077_v11  ;;  %1725 = vmatpush.msrb.mxu3 %v3520_v12  ;;  %v3548_v11 = vld [vmem:[#allocation38_spill] sm:$0xff] }
 0x1f7   : > { %1710 = vmatpush.msrb.mxu2 %v3085_v23  ;;  %1726 = vmatpush.msrb.mxu3 %v3087_v4  ;;  %v1468_v23 = vperm.slane %v3281_v57, 0  ;;  %v1469_v4 = vperm.slane %v3281_v57, 1 }
 0x1f9   : > { %1711 = vmatpush.msrb.mxu2 %v3095_v19  ;;  %1727 = vmatpush.msrb.mxu3 %v3525_v3 }
 0x1fb   : > { %1712 = vmatpush.msrb.mxu2 %v3103_v63  ;;  %1728 = vmatpush.msrb.mxu3 %v3528_v10  ;;  %v3552_v10 = vld [vmem:[#allocation21_spill] sm:$0xff] }
 0x1fd   : > { %1713 = vmatpush.msrb.mxu2 %v3113_v41  ;;  %1729 = vmatpush.msrb.mxu3 %v3531_v40  ;;  %v1473_v40 = vperm.slane %v3281_v57, 5 }
 0x1ff   : > { %1714 = vmatpush.msrb.mxu2 %v3121_v17  ;;  %1730 = vmatpush.msrb.mxu3 %v3123_v21  ;;  %v1494_v21 = vperm.slane %v3283_v9, 0 }
 0x201   : > { %1715 = vmatpush.msrb.mxu2 %v3130_v25  ;;  %1731 = vmatpush.msrb.mxu3 %v3132_v26  ;;  %v1495_v26 = vperm.slane %v3283_v9, 1 }
 0x203   : > { %1716 = vmatpush.msrb.mxu2 %v3138_v31  ;;  %1732 = vmatpush.msrb.mxu3 %v3538_v15 }
 0x205   : > { %1717 = vmatpush.msrb.mxu2 %v3541_v29  ;;  %1733 = vmatpush.msrb.mxu3 %v3542_v44  ;;  %v3554_v29 = vld [vmem:[#allocation40_spill] sm:$0xff] }
 0x207   : > { %1718 = vmatpush.msrb.mxu2 %v3545_v49  ;;  %1734 = vmatpush.msrb.mxu3 %v3546_v55 }
 0x208   : > { %1415 = vmatmul.f32.vlgmr.msrb.gmra.mxu2 %v1303_v35  ;;  %1438 = vmatmul.f32.vlgmr.msrb.gmra.mxu3 %v1303_v35 }
 0x23e   : > { %v1227_v6 = vpop.f32.mrf.mxu0  ;;  %v1250_v52 = vpop.f32.mrf.mxu1 }
 0x23f   : > { %v1444_v39 = vmul.f32 %v1227_v6, %v3553_v47  ;;  %v1445_v44 = vmul.f32 %v1250_v52, %v3554_v29 }
 0x243   : > { %v1181_v16 = vpop.f32.mrf.mxu2  ;;  %v1204_v24 = vpop.f32.mrf.mxu3 }
 0x244   : > { %v1442_v0 = vmul.f32 %v1181_v16, %v3547_v51  ;;  %v1443_v63 = vmul.f32 %v1204_v24, %v3548_v11 }
 0x248   : > { %v3277_v46 = vpop.f32.mrf.mxu0  ;;  %v3279_v50 = vpop.f32.mrf.mxu1 }
 0x24d   : > { %v1184_v45 = vpop.f32.mrf.mxu2  ;;  %v1207_v53 = vpop.f32.mrf.mxu3 }
 0x24e   : > { %v1448_v54 = vmul.f32 %v1184_v45, %v3549_v62  ;;  %v1449_v34 = vmul.f32 %v1207_v53, %v3550_v1  ;;  %v1496_v53 = vperm.slane %v3283_v9, 2 }
 0x252   : > { %v1321_v19 = vpop.f32.mrf.mxu0  ;;  %v1344_v41 = vpop.f32.mrf.mxu1 }
 0x253   : > { %v1454_v17 = vsub.f32 %v1442_v0, %v1321_v19  ;;  %v1455_v25 = vsub.f32 %v1443_v63, %v1344_v41  ;;  %v1497_v0 = vperm.slane %v3283_v9, 3  ;;  %v3555_v63 = vld [vmem:[#allocation42_spill] sm:$0xff] }
 0x255   : > { %v1480_v31 = vmul.f32 %v1468_v23, %v1454_v17  ;;  %v1481_v42 = vmul.f32 %v1469_v4, %v1455_v25 }
 0x257   : > { %v1506_v20 = vadd.f32 %v1494_v21, %v1480_v31  ;;  %v1507_v36 = vadd.f32 %v1495_v26, %v1481_v42  ;;  %v1273_v27 = vpop.f32.mrf.mxu2  ;;  %v1296_v30 = vpop.f32.mrf.mxu3 }
 0x258   : > { %v1446_v14 = vmul.f32 %v1273_v27, %v3551_v5  ;;  %v1447_v32 = vmul.f32 %v1296_v30, %v3552_v10 }
 0x259   : > { %1518 = vst [vmem:[%s3292_s20] sm:$0xff] %v1506_v20  ;;  %v3557_v20 = vld [vmem:[#allocation22_spill] sm:$0xff] }
 0x25a   : > { %1519 = vst [vmem:[%s3292_s20 + $0x8] sm:$0xff] %v1507_v36 }
 0x25c   : > { %v1324_v43 = vpop.f32.mrf.mxu0  ;;  %v1347_v18 = vpop.f32.mrf.mxu1 }
 0x25d   : > { %v1460_v60 = vsub.f32 %v1448_v54, %v1324_v43  ;;  %v1461_v12 = vsub.f32 %v1449_v34, %v1347_v18 }
 0x25f   : > { %v1486_v56 = vmul.f32 %v1468_v23, %v1460_v60  ;;  %v1487_v61 = vmul.f32 %v1469_v4, %v1461_v12  ;;  %v1450_v23 = vmul.f32 %v3277_v46, %v3555_v63  ;;  %v3556_v4 = vld [vmem:[#allocation43_spill] sm:$0xff] }
 0x260   : > { %v1451_v19 = vmul.f32 %v3279_v50, %v3556_v4  ;;  %v3558_v46 = vld [vmem:[#allocation23_spill] sm:$0xff] }
 0x261   : > { %v1512_v7 = vadd.f32 %v1494_v21, %v1486_v56  ;;  %v1513_v58 = vadd.f32 %v1495_v26, %v1487_v61  ;;  %v1276_v2 = vpop.f32.mrf.mxu2  ;;  %v1299_v3 = vpop.f32.mrf.mxu3 }
 0x262   : > { %v1452_v36 = vmul.f32 %v1276_v2, %v3557_v20  ;;  %v1453_v27 = vmul.f32 %v1299_v3, %v3558_v46 }
 0x263   : > { %1524 = vst [vmem:[%s3292_s20 + $0x30] sm:$0xff] %v1512_v7 }
 0x264   : > { %1525 = vst [vmem:[%s3292_s20 + $0x38] sm:$0xff] %v1513_v58 }
 0x267   : > { %v1413_v22 = vpop.f32.mrf.mxu0  ;;  %v1436_v28 = vpop.f32.mrf.mxu1 }
 0x268   : > { %v1458_v35 = vsub.f32 %v1446_v14, %v1413_v22  ;;  %v1459_v48 = vsub.f32 %v1447_v32, %v1436_v28 }
 0x26a   : > { %v1484_v33 = vmul.f32 %v1472_v37, %v1458_v35  ;;  %v1485_v15 = vmul.f32 %v1473_v40, %v1459_v48 }
 0x26c   : > { %v1510_v49 = vadd.f32 %v1498_v38, %v1484_v33  ;;  %v1511_v55 = vadd.f32 %v1499_v13, %v1485_v15  ;;  %v1367_v16 = vpop.f32.mrf.mxu2  ;;  %v1390_v24 = vpop.f32.mrf.mxu3 }
 0x26d   : > { %v1456_v45 = vsub.f32 %v1444_v39, %v1367_v16  ;;  %v1457_v51 = vsub.f32 %v1445_v44, %v1390_v24 }
 0x26e   : > { %1522 = vst [vmem:[%s3292_s20 + $0x20] sm:$0xff] %v1510_v49 }
 0x26f   : > { %1523 = vst [vmem:[%s3292_s20 + $0x28] sm:$0xff] %v1511_v55  ;;  %v1482_v6 = vmul.f32 %v1470_v59, %v1456_v45  ;;  %v1483_v52 = vmul.f32 %v1471_v8, %v1457_v51 }
 0x271   : > { %v1508_v11 = vadd.f32 %v1496_v53, %v1482_v6  ;;  %v1509_v57 = vadd.f32 %v1497_v0, %v1483_v52 }
 0x273   : > { %1520 = vst [vmem:[%s3292_s20 + $0x10] sm:$0xff] %v1508_v11 }
 0x274   : > { %1521 = vst [vmem:[%s3292_s20 + $0x18] sm:$0xff] %v1509_v57 }
 0x275   : > { %v1370_v41 = vpop.f32.mrf.mxu2  ;;  %v1393_v17 = vpop.f32.mrf.mxu3 }
 0x276   : > { %v1462_v9 = vsub.f32 %v1450_v23, %v1370_v41  ;;  %v1463_v21 = vsub.f32 %v1451_v19, %v1393_v17 }
 0x278   : > { %v1488_v25 = vmul.f32 %v1470_v59, %v1462_v9  ;;  %v1489_v26 = vmul.f32 %v1471_v8, %v1463_v21 }
 0x27a   : > { %v1514_v31 = vadd.f32 %v1496_v53, %v1488_v25  ;;  %v1515_v42 = vadd.f32 %v1497_v0, %v1489_v26 }
 0x27c   : > { %1526 = vst [vmem:[%s3292_s20 + $0x40] sm:$0xff] %v1514_v31 }
 0x27d   : > { %1527 = vst [vmem:[%s3292_s20 + $0x48] sm:$0xff] %v1515_v42 }
 0x28b   : > { %v1416_v50 = vpop.f32.mrf.mxu2  ;;  %v1439_v30 = vpop.f32.mrf.mxu3 }
 0x28c   : > { %v1464_v62 = vsub.f32 %v1452_v36, %v1416_v50  ;;  %v1465_v54 = vsub.f32 %v1453_v27, %v1439_v30 }
 0x28e   : > { %v1490_v1 = vmul.f32 %v1472_v37, %v1464_v62  ;;  %v1491_v34 = vmul.f32 %v1473_v40, %v1465_v54 }
 0x290   : > { %v1516_v43 = vadd.f32 %v1498_v38, %v1490_v1  ;;  %v1517_v18 = vadd.f32 %v1499_v13, %v1491_v34 }
 0x292   : > { %1528 = vst [vmem:[%s3292_s20 + $0x50] sm:$0xff] %v1516_v43 }
 0x293   : > { %1529 = vst [vmem:[%s3292_s20 + $0x58] sm:$0xff] %v1517_v18 }
 0x294   : > { %2091 = shalt.err (!%p2088_p8)
}
 0x295   : > { %s2154_s16 = smov 768   ;;  %s2155_s9 = smov 48  }
 0x296   : > { %1763 = dma.vmem_to_hbm [thread:$0]  (%p2295_p2), %s1545_s10, 1536, %s1547_s12, %s1531_s8, %s2154_s16, %s2154_s16, %s2155_s9  }
 0x297 PF: > { %p1805_p9 = scmp.ge.s32.totalorder %s2142_s27, 2  ;;  %s1561_s20 = sand.u32 1, %s2130_s24  }
 0x298   : > { %s1562_s21 = scalar_lea.sflag [#allocation4], %s1561_s20 }
 0x299   : > { %p1789_p10 = pnand %p1805_p9, %p2299_p4 }
 0x29b   : > { %p1790_p12 = pneg %p1789_p10 }
 0x29d   : > { %2125 = dma.done.wait (%p1790_p12), %s1562_s21, 1536  }
 0x29e   : > { %2127 = vsyncadd (%p1790_p12), %s1562_s21, 4294965760  ;;  %p23_p13 = scmp.ge.s32.totalorder %s2269_s14, 6   ;;  %s3559_s24 = smov %s2134_s25 }
 0x29f   : > { %s3560_s25 = smov %s2138_s26  ;;  %s3561_s26 = smov %s2280_s18 }
 0x2a0   : > { %s3562_s27 = smov %s2269_s14  ;;  %25 = sbr.rel (!%p23_p13) target bundleno = 11 (0xb), region = 117 }
 0x2a5   :  { %1568 = vsyncpa [#allocation3], 1 }
 0x2a6   :  { %1570 = vsyncpa [#allocation3 + $0x1], 1 }
 0x2a7   :  { %1571 = vsyncpa [#allocation6], 1 }
 0x2a8   :  { %1572 = vsyncpa [#allocation9], 1 }
 0x2a9   :  { %1573 = vsyncpa [#allocation12], 1 }
 0x2aa   :  { %1574 = vsyncpa [#allocation4], 1 }
 0x2ab   :  { %1576 = vsyncpa [#allocation4 + $0x1], 1 }

</bundles_post_ra>
